<compile_context>
chip_gen: v5e
topology: v5e:2x2
jax: 0.10.0
libtpu: 0.0.40
codegen_flags: <defaults>
</compile_context>

<pallas_src>
import functools

import jax
import jax.numpy as jnp
from jax.experimental import pallas as pl
from jax.experimental.pallas import tpu as pltpu

VMEM_SPEC = pl.BlockSpec(memory_space=pltpu.MemorySpace.VMEM)
LN_EPS = 1e-12
MASK_NEG = -1e4


def _round_up(x, m):
    return ((x + m - 1) // m) * m


def _ln(x, g, b, eps):
    """f32 LayerNorm over the last axis; g/b are (1, H) and broadcast."""
    mu = jnp.mean(x, axis=-1, keepdims=True)
    var = jnp.mean((x - mu) ** 2, axis=-1, keepdims=True)
    return (x - mu) * jax.lax.rsqrt(var + eps) * g + b


def _gelu(x):
    # TODO(synk): HF bert-base uses exact erf GELU; tanh approximation kept
    # (guaranteed Mosaic lowering on all TPU generations).
    return 0.5 * x * (1.0 + jnp.tanh(0.7978845608028654 * (x + 0.044715 * x * x * x)))


# ------------------------- fused encoder kernel -----------------------------
# grid = (B, L); B "parallel", L "arbitrary".  The residual stream for the
# current batch element is carried across the L axis in h_scr (VMEM).

def _encoder_kernel(h0_ref, mask_ref, embg_ref, embb_ref,
                    wqkv_ref, bqkv_ref, wo_ref, bo_ref, g1_ref, b1_ref,
                    wi_ref, bi_ref, wf_ref, bf_ref, g2_ref, b2_ref,
                    o_ref,
                    h_scr, qkv_scr, ctx_scr,
                    *, nh, hd, hidden, inter, ffn_chunk, scale, eps):
    l = pl.program_id(1)

    # ---- first layer step: embedding LayerNorm -> VMEM residual stream ----
    @pl.when(l == 0)
    def _():
        e = h0_ref[0].astype(jnp.float32)                         # (S, H)
        h_scr[...] = _ln(e, embg_ref[0], embb_ref[0], eps)

    h = h_scr[...]                                                # (S, H) f32

    # ---- fused QKV projection: one (S,H)@(H,3H) bf16 MXU pass, f32 acc ----
    qkv_scr[...] = jnp.dot(h.astype(jnp.bfloat16), wqkv_ref[0],
                           preferred_element_type=jnp.float32) + bqkv_ref[0]

    # Additive key mask, broadcast in-kernel over heads and query rows.
    bias = (1.0 - mask_ref[0]) * MASK_NEG                         # (1, S)

    # ---- per-head attention; ctx_h staged into an (S,H) VMEM scratch so the
    #      output projection below is a single full-K matmul.  Static lane
    #      offsets keep Mosaic slicing static; each head's (S,S) score block
    #      dies at the store that ends its iteration.
    for n in range(nh):
        lo = n * hd
        q = qkv_scr[:, lo:lo + hd].astype(jnp.bfloat16)                        # (S, hd)
        k = qkv_scr[:, hidden + lo:hidden + lo + hd].astype(jnp.bfloat16)
        v = qkv_scr[:, 2 * hidden + lo:2 * hidden + lo + hd].astype(jnp.bfloat16)
        s = jax.lax.dot_general(
            q, k, dimension_numbers=(((1,), (1,)), ((), ())),
            preferred_element_type=jnp.float32) * scale + bias                 # (S, S)
        m = jnp.max(s, axis=-1, keepdims=True)
        p = jnp.exp(s - m)
        p = p * pl.reciprocal(jnp.sum(p, axis=-1, keepdims=True), approx=True)
        ctx_scr[:, lo:lo + hd] = jnp.dot(p.astype(jnp.bfloat16), v,
                                         preferred_element_type=jnp.float32)

    # ---- output projection: ONE (S,H)@(H,H) bf16 matmul against the bf16 Wo
    #      ref (no f32 copy, no per-head K=hd contractions); + residual + LN.
    x = jnp.dot(ctx_scr[...].astype(jnp.bfloat16), wo_ref[0],
                preferred_element_type=jnp.float32) + bo_ref[0] + h
    x = _ln(x, g1_ref[0], b1_ref[0], eps)

    # ---- FFN chunked over the intermediate dim: the GELU intermediate is
    #      (S, ffn_chunk) instead of (S, I); accumulate into the residual.
    x_bf = x.astype(jnp.bfloat16)
    z = x + bf_ref[0]
    for c0 in range(0, inter, ffn_chunk):
        t = jnp.dot(x_bf, wi_ref[0, :, c0:c0 + ffn_chunk],
                    preferred_element_type=jnp.float32) + bi_ref[0, :, c0:c0 + ffn_chunk]
        t = _gelu(t)
        z = z + jnp.dot(t.astype(jnp.bfloat16), wf_ref[0, c0:c0 + ffn_chunk, :],
                        preferred_element_type=jnp.float32)
    z = _ln(z, g2_ref[0], b2_ref[0], eps)

    # Carry the residual stream to the next layer entirely in VMEM; only the
    # last layer writes the (bf16) hidden state back to HBM.
    h_scr[...] = z

    @pl.when(l == pl.num_programs(1) - 1)
    def _():
        o_ref[0] = z.astype(o_ref.dtype)


def bert_encoder(h0, mask_b1s, params, cfg):
    B, S, H = h0.shape
    L, I, nh = cfg["layers"], cfg["intermediate"], cfg["heads"]
    hd = H // nh
    ffn_chunk = min(I, 512)
    if I % ffn_chunk:
        ffn_chunk = I

    act = lambda b, l: (b, 0, 0)     # activations: indexed by batch only
    lyr = lambda b, l: (l, 0, 0)     # stacked per-layer weights: indexed by layer
    cst = lambda b, l: (0, 0, 0)     # embedding LN params: constant

    lp = params["layers"]
    kernel = functools.partial(
        _encoder_kernel, nh=nh, hd=hd, hidden=H, inter=I,
        ffn_chunk=ffn_chunk, scale=1.0 / float(hd) ** 0.5, eps=LN_EPS)

    return pl.pallas_call(
        kernel,
        out_shape=jax.ShapeDtypeStruct((B, S, H), jnp.bfloat16),
        grid=(B, L),
        in_specs=[
            pl.BlockSpec((1, S, H), act),          # embeddings (bf16)
            pl.BlockSpec((1, 1, S), act),          # attention mask
            pl.BlockSpec((1, 1, H), cst),          # emb LN gamma
            pl.BlockSpec((1, 1, H), cst),          # emb LN beta
            pl.BlockSpec((1, H, 3 * H), lyr),      # wqkv (bf16, fused Q|K|V)
            pl.BlockSpec((1, 1, 3 * H), lyr),      # bqkv
            pl.BlockSpec((1, H, H), lyr),          # wo (bf16)
            pl.BlockSpec((1, 1, H), lyr),          # bo
            pl.BlockSpec((1, 1, H), lyr),          # ln1 gamma
            pl.BlockSpec((1, 1, H), lyr),          # ln1 beta
            pl.BlockSpec((1, H, I), lyr),          # wi (bf16)
            pl.BlockSpec((1, 1, I), lyr),          # bi
            pl.BlockSpec((1, I, H), lyr),          # wf (bf16)
            pl.BlockSpec((1, 1, H), lyr),          # bf
            pl.BlockSpec((1, 1, H), lyr),          # ln2 gamma
            pl.BlockSpec((1, 1, H), lyr),          # ln2 beta
        ],
        out_specs=pl.BlockSpec((1, S, H), act),
        scratch_shapes=[
            pltpu.VMEM((S, H), jnp.float32),       # residual-stream carry across L
            pltpu.VMEM((S, 3 * H), jnp.float32),   # fused QKV activations
            pltpu.VMEM((S, H), jnp.float32),       # per-head context concat
        ],
        compiler_params=pltpu.CompilerParams(
            # Batch axis sharded over TensorCores (v7x); layer axis must stay
            # sequential for the VMEM-resident residual carry.  Weight blocks
            # change every layer step, so the default double-buffering is what
            # overlaps layer l+1 weight DMA with layer l compute.
            dimension_semantics=("parallel", "arbitrary"),
            vmem_limit_bytes=48 * 1024 * 1024),
    )(h0, mask_b1s, params["emb_ln_g"], params["emb_ln_b"],
      lp["wqkv"], lp["bqkv"], lp["wo"], lp["bo"], lp["ln1_g"], lp["ln1_b"],
      lp["wi"], lp["bi"], lp["wf"], lp["bf"], lp["ln2_g"], lp["ln2_b"])


# ------------------- fused pooler + classifier kernel -----------------------

def _pool_cls_kernel(cls_ref, wp_ref, bp_ref, wc_ref, bc_ref, o_ref):
    """BERT pooler (tanh on CLS) + classifier; output lane-padded to 128."""
    pooled = jnp.tanh(jnp.dot(cls_ref[...], wp_ref[...],
                              preferred_element_type=jnp.float32) + bp_ref[...])
    logits = jnp.dot(pooled.astype(jnp.bfloat16), wc_ref[...],
                     preferred_element_type=jnp.float32) + bc_ref[...]
    o_ref[...] = logits.astype(o_ref.dtype)


def pooler_classifier(cls_bf16, params):
    B, _ = cls_bf16.shape
    LP = params["wc"].shape[1]
    return pl.pallas_call(
        _pool_cls_kernel,
        out_shape=jax.ShapeDtypeStruct((B, LP), jnp.float32),
        in_specs=[VMEM_SPEC] * 5,
        out_specs=VMEM_SPEC,
    )(cls_bf16, params["wp"], params["bp"], params["wc"], params["bc"])


# --------------------------- parameter synthesis ----------------------------

class _KeyGen:
    def __init__(self, key):
        self.key = key

    def __call__(self):
        self.key, sub = jax.random.split(self.key)
        return sub


def init_params(key, cfg):
    H, I, L = cfg["hidden"], cfg["intermediate"], cfg["layers"]
    NL = cfg["num_labels"]
    LP = _round_up(NL, 128)          # lane-dense classifier output
    kg = _KeyGen(key)

    def nrm(shape, dtype=jnp.float32):
        return (0.02 * jax.random.normal(kg(), shape, dtype=jnp.float32)).astype(dtype)

    wc = jnp.zeros((H, LP), jnp.float32)
    wc = wc.at[:, :NL].set(0.02 * jax.random.normal(kg(), (H, NL), dtype=jnp.float32))

    return {
        "word_emb": nrm((cfg["vocab"], H)),
        "pos_emb": nrm((cfg["max_pos"], H)),
        "type_emb": nrm((2, H)),
        "emb_ln_g": jnp.ones((1, 1, H), jnp.float32),
        "emb_ln_b": jnp.zeros((1, 1, H), jnp.float32),
        "wp": nrm((H, H), jnp.bfloat16), "bp": jnp.zeros((1, H), jnp.float32),
        "wc": wc.astype(jnp.bfloat16), "bc": jnp.zeros((1, LP), jnp.float32),
        # Per-layer params stacked on a leading L axis (one pallas_call, grid=(B,L)).
        "layers": {
            "wqkv": nrm((L, H, 3 * H), jnp.bfloat16),
            "bqkv": jnp.zeros((L, 1, 3 * H), jnp.float32),
            "wo": nrm((L, H, H), jnp.bfloat16),
            "bo": jnp.zeros((L, 1, H), jnp.float32),
            "ln1_g": jnp.ones((L, 1, H), jnp.float32),
            "ln1_b": jnp.zeros((L, 1, H), jnp.float32),
            "wi": nrm((L, H, I), jnp.bfloat16),
            "bi": jnp.zeros((L, 1, I), jnp.float32),
            "wf": nrm((L, I, H), jnp.bfloat16),
            "bf": jnp.zeros((L, 1, H), jnp.float32),
            "ln2_g": jnp.ones((L, 1, H), jnp.float32),
            "ln2_b": jnp.zeros((L, 1, H), jnp.float32),
        },
    }


# ------------------------------- forward pass -------------------------------

def bert_classifier_forward(params, cfg, input_ids, attention_mask=None, labels=None):
    B, S = input_ids.shape
    NL = cfg["num_labels"]
    if attention_mask is None:
        attention_mask = jnp.ones((B, S), dtype=jnp.float32)
    mask_b1s = attention_mask.astype(jnp.float32).reshape(B, 1, S)

    # ---- embeddings (token gather stays in JAX; LN fused into encoder) ----
    we = jnp.take(params["word_emb"], input_ids, axis=0)          # (B,S,H)
    pe = params["pos_emb"][:S][None, :, :]                        # (1,S,H)
    te = params["type_emb"][0][None, None, :]                     # token_type_ids = 0
    h0 = (we + pe + te).astype(jnp.bfloat16)                      # bf16 HBM activations

    # ---- full 12-op encoder stack: ONE pallas_call, hidden resident in VMEM ----
    h = bert_encoder(h0, mask_b1s, params, cfg)                   # (B,S,H) bf16

    # ---- pooler (= outputs[1]) + classifier, fused, lane-padded logits ----
    cls = h[:, 0, :]                                              # (B,H) bf16
    logits = pooler_classifier(cls, params)[:, :NL]               # (B,NL) f32

    if labels is not None:
        # Tiny CE reduction on (B, NL) kept as JAX glue (microscopic work).
        logp = jax.nn.log_softmax(logits, axis=-1)
        nll = -jnp.take_along_axis(logp, labels[:, None].astype(jnp.int32), axis=1)
        loss = jnp.mean(nll)
        return {"loss": loss, "logits": logits}
    return logits


# ----------------------------------- main -----------------------------------

if __name__ == "__main__":
    cfg = dict(vocab=100, hidden=32, heads=4, layers=2,
               intermediate=64, max_pos=16, num_labels=3)

    key = jax.random.PRNGKey(0)
    pkey, ikey, lkey = jax.random.split(key, 3)
    params = init_params(pkey, cfg)

    B, S = 2, 8
    input_ids = jax.random.randint(ikey, (B, S), 0, cfg["vocab"], dtype=jnp.int32)
    attention_mask = jnp.ones((B, S), dtype=jnp.int32)
    labels = jax.random.randint(lkey, (B,), 0, cfg["num_labels"], dtype=jnp.int32)

    fwd_with_loss = jax.jit(
        lambda ids, m, y: bert_classifier_forward(params, cfg, ids, m, y))
    fwd_logits = jax.jit(
        lambda ids, m: bert_classifier_forward(params, cfg, ids, m))

    # with labels -> {'loss', 'logits'}
    out = fwd_with_loss(input_ids, attention_mask, labels)
    jax.block_until_ready(out)
    assert out["logits"].shape == (B, cfg["num_labels"])
    assert out["loss"].shape == ()
    assert bool(jnp.isfinite(out["loss"]))

    # without labels -> logits only
    logits = fwd_logits(input_ids, attention_mask)
    jax.block_until_ready(logits)
    assert logits.shape == (B, cfg["num_labels"])

    print("KERNEL_OK")
</pallas_src>

<mosaic_0001>
module attributes {stable_mosaic.version = 11 : i64} {
  func.func @_encoder_kernel(%arg0: i32, %arg1: i32, %arg2: memref<1x8x32xbf16, #tpu.memory_space<vmem>>, %arg3: memref<1x1x8xf32, #tpu.memory_space<vmem>>, %arg4: memref<1x1x32xf32, #tpu.memory_space<vmem>>, %arg5: memref<1x1x32xf32, #tpu.memory_space<vmem>>, %arg6: memref<1x32x96xbf16, #tpu.memory_space<vmem>>, %arg7: memref<1x1x96xf32, #tpu.memory_space<vmem>>, %arg8: memref<1x32x32xbf16, #tpu.memory_space<vmem>>, %arg9: memref<1x1x32xf32, #tpu.memory_space<vmem>>, %arg10: memref<1x1x32xf32, #tpu.memory_space<vmem>>, %arg11: memref<1x1x32xf32, #tpu.memory_space<vmem>>, %arg12: memref<1x32x64xbf16, #tpu.memory_space<vmem>>, %arg13: memref<1x1x64xf32, #tpu.memory_space<vmem>>, %arg14: memref<1x64x32xbf16, #tpu.memory_space<vmem>>, %arg15: memref<1x1x32xf32, #tpu.memory_space<vmem>>, %arg16: memref<1x1x32xf32, #tpu.memory_space<vmem>>, %arg17: memref<1x1x32xf32, #tpu.memory_space<vmem>>, %arg18: memref<1x8x32xbf16, #tpu.memory_space<vmem>>, %arg19: memref<8x32xf32, #tpu.memory_space<vmem>>, %arg20: memref<8x96xf32, #tpu.memory_space<vmem>>, %arg21: memref<8x32xf32, #tpu.memory_space<vmem>>) attributes {dimension_semantics = [#tpu.dimension_semantics<parallel>, #tpu.dimension_semantics<arbitrary>], iteration_bounds = array<i64: 2, 2>, scalar_prefetch = 0 : i64, scratch_operands = 3 : i64, tpu.core_type = #tpu.core_type<tc>, window_params = [{transform_indices = @transform_0, window_bounds = array<i64: 1, 8, 32>}, {transform_indices = @transform_1, window_bounds = array<i64: 1, 1, 8>}, {pipeline_mode = #tpu.pipeline_mode<synchronous>, transform_indices = @transform_2, window_bounds = array<i64: 1, 1, 32>}, {pipeline_mode = #tpu.pipeline_mode<synchronous>, transform_indices = @transform_3, window_bounds = array<i64: 1, 1, 32>}, {transform_indices = @transform_4, window_bounds = array<i64: 1, 32, 96>}, {transform_indices = @transform_5, window_bounds = array<i64: 1, 1, 96>}, {transform_indices = @transform_6, window_bounds = array<i64: 1, 32, 32>}, {transform_indices = @transform_7, window_bounds = array<i64: 1, 1, 32>}, {transform_indices = @transform_8, window_bounds = array<i64: 1, 1, 32>}, {transform_indices = @transform_9, window_bounds = array<i64: 1, 1, 32>}, {transform_indices = @transform_10, window_bounds = array<i64: 1, 32, 64>}, {transform_indices = @transform_11, window_bounds = array<i64: 1, 1, 64>}, {transform_indices = @transform_12, window_bounds = array<i64: 1, 64, 32>}, {transform_indices = @transform_13, window_bounds = array<i64: 1, 1, 32>}, {transform_indices = @transform_14, window_bounds = array<i64: 1, 1, 32>}, {transform_indices = @transform_15, window_bounds = array<i64: 1, 1, 32>}, {transform_indices = @transform_16, window_bounds = array<i64: 1, 8, 32>}]} {
    %c0_i32 = arith.constant 0 : i32
    %0 = arith.cmpi eq, %arg1, %c0_i32 : i32
    %1 = arith.extui %0 : i1 to i32
    %c0_i32_0 = arith.constant 0 : i32
    %2 = arith.cmpi ne, %1, %c0_i32_0 : i32
    scf.if %2 {
      %c0_108 = arith.constant 0 : index
      %c0_109 = arith.constant 0 : index
      %c0_110 = arith.constant 0 : index
      %211 = vector.load %arg2[%c0_108, %c0_109, %c0_110] : memref<1x8x32xbf16, #tpu.memory_space<vmem>>, vector<1x8x32xbf16>
      %212 = vector.shape_cast %211 : vector<1x8x32xbf16> to vector<8x32xbf16>
      %213 = arith.extf %212 : vector<8x32xbf16> to vector<8x32xf32>
      %c0_111 = arith.constant 0 : index
      %c0_112 = arith.constant 0 : index
      %c0_113 = arith.constant 0 : index
      %214 = vector.load %arg4[%c0_111, %c0_112, %c0_113] : memref<1x1x32xf32, #tpu.memory_space<vmem>>, vector<1x1x32xf32>
      %215 = vector.shape_cast %214 : vector<1x1x32xf32> to vector<1x32xf32>
      %c0_114 = arith.constant 0 : index
      %c0_115 = arith.constant 0 : index
      %c0_116 = arith.constant 0 : index
      %216 = vector.load %arg5[%c0_114, %c0_115, %c0_116] : memref<1x1x32xf32, #tpu.memory_space<vmem>>, vector<1x1x32xf32>
      %217 = vector.shape_cast %216 : vector<1x1x32xf32> to vector<1x32xf32>
      %cst_117 = arith.constant dense<0.000000e+00> : vector<8xf32>
      %218 = vector.multi_reduction <add>, %213, %cst_117 [1] : vector<8x32xf32> to vector<8xf32>
      %219 = vector.shape_cast %218 : vector<8xf32> to vector<8x1xf32>
      %cst_118 = arith.constant 3.200000e+01 : f32
      %220 = vector.broadcast %cst_118 : f32 to vector<8x1xf32>
      %221 = arith.divf %219, %220 : vector<8x1xf32>
      %222 = vector.broadcast %221 : vector<8x1xf32> to vector<8x32xf32>
      %223 = arith.subf %213, %222 : vector<8x32xf32>
      %224 = arith.mulf %223, %223 : vector<8x32xf32>
      %cst_119 = arith.constant dense<0.000000e+00> : vector<8xf32>
      %225 = vector.multi_reduction <add>, %224, %cst_119 [1] : vector<8x32xf32> to vector<8xf32>
      %226 = vector.shape_cast %225 : vector<8xf32> to vector<8x1xf32>
      %cst_120 = arith.constant 3.200000e+01 : f32
      %227 = vector.broadcast %cst_120 : f32 to vector<8x1xf32>
      %228 = arith.divf %226, %227 : vector<8x1xf32>
      %229 = vector.broadcast %221 : vector<8x1xf32> to vector<8x32xf32>
      %230 = arith.subf %213, %229 : vector<8x32xf32>
      %cst_121 = arith.constant 9.99999996E-13 : f32
      %231 = vector.broadcast %cst_121 : f32 to vector<8x1xf32>
      %232 = arith.addf %228, %231 : vector<8x1xf32>
      %233 = math.rsqrt %232 : vector<8x1xf32>
      %234 = vector.broadcast %233 : vector<8x1xf32> to vector<8x32xf32>
      %235 = arith.mulf %230, %234 : vector<8x32xf32>
      %236 = vector.broadcast %215 : vector<1x32xf32> to vector<8x32xf32>
      %237 = arith.mulf %235, %236 : vector<8x32xf32>
      %238 = vector.broadcast %217 : vector<1x32xf32> to vector<8x32xf32>
      %239 = arith.addf %237, %238 : vector<8x32xf32>
      %c0_122 = arith.constant 0 : index
      %c0_123 = arith.constant 0 : index
      %240 = vector.load %arg19[%c0_122, %c0_123] : memref<8x32xf32, #tpu.memory_space<vmem>>, vector<8x32xf32>
      tpu.vector_store %arg19[%c0_122, %c0_123], %239 {strides = array<i32>} : memref<8x32xf32, #tpu.memory_space<vmem>>, vector<8x32xf32>,
    } else {
    }
    %c0 = arith.constant 0 : index
    %c0_1 = arith.constant 0 : index
    %3 = vector.load %arg19[%c0, %c0_1] : memref<8x32xf32, #tpu.memory_space<vmem>>, vector<8x32xf32>
    %4 = arith.truncf %3 : vector<8x32xf32> to vector<8x32xbf16>
    %c0_2 = arith.constant 0 : index
    %c0_3 = arith.constant 0 : index
    %c0_4 = arith.constant 0 : index
    %5 = vector.load %arg6[%c0_2, %c0_3, %c0_4] : memref<1x32x96xbf16, #tpu.memory_space<vmem>>, vector<1x32x96xbf16>
    %6 = vector.shape_cast %5 : vector<1x32x96xbf16> to vector<32x96xbf16>
    %cst = arith.constant dense<0.000000e+00> : vector<8x96xf32>
    %7 = tpu.matmul %4, %6, %cst {dimension_numbers = #tpu.dot_dimension_numbers<[1], [0], [0], [1], [0, 0, 1, 1], [], []>} : vector<8x32xbf16>, vector<32x96xbf16>, vector<8x96xf32> -> vector<8x96xf32>
    %c0_5 = arith.constant 0 : index
    %c0_6 = arith.constant 0 : index
    %c0_7 = arith.constant 0 : index
    %8 = vector.load %arg7[%c0_5, %c0_6, %c0_7] : memref<1x1x96xf32, #tpu.memory_space<vmem>>, vector<1x1x96xf32>
    %9 = vector.shape_cast %8 : vector<1x1x96xf32> to vector<1x96xf32>
    %10 = vector.broadcast %9 : vector<1x96xf32> to vector<8x96xf32>
    %11 = arith.addf %7, %10 : vector<8x96xf32>
    %c0_8 = arith.constant 0 : index
    %c0_9 = arith.constant 0 : index
    %12 = vector.load %arg20[%c0_8, %c0_9] : memref<8x96xf32, #tpu.memory_space<vmem>>, vector<8x96xf32>
    tpu.vector_store %arg20[%c0_8, %c0_9], %11 {strides = array<i32>} : memref<8x96xf32, #tpu.memory_space<vmem>>, vector<8x96xf32>,
    %c0_10 = arith.constant 0 : index
    %c0_11 = arith.constant 0 : index
    %c0_12 = arith.constant 0 : index
    %13 = vector.load %arg3[%c0_10, %c0_11, %c0_12] : memref<1x1x8xf32, #tpu.memory_space<vmem>>, vector<1x1x8xf32>
    %14 = vector.shape_cast %13 : vector<1x1x8xf32> to vector<1x8xf32>
    %cst_13 = arith.constant 1.000000e+00 : f32
    %15 = vector.broadcast %cst_13 : f32 to vector<1x8xf32>
    %16 = arith.subf %15, %14 : vector<1x8xf32>
    %cst_14 = arith.constant -1.000000e+04 : f32
    %17 = vector.broadcast %cst_14 : f32 to vector<1x8xf32>
    %18 = arith.mulf %16, %17 : vector<1x8xf32>
    %c0_15 = arith.constant 0 : index
    %c0_16 = arith.constant 0 : index
    %19 = vector.load %arg20[%c0_15, %c0_16] : memref<8x96xf32, #tpu.memory_space<vmem>>, vector<8x8xf32>
    %20 = arith.truncf %19 : vector<8x8xf32> to vector<8x8xbf16>
    %c0_17 = arith.constant 0 : index
    %c32 = arith.constant 32 : index
    %21 = vector.load %arg20[%c0_17, %c32] : memref<8x96xf32, #tpu.memory_space<vmem>>, vector<8x8xf32>
    %22 = arith.truncf %21 : vector<8x8xf32> to vector<8x8xbf16>
    %c0_18 = arith.constant 0 : index
    %c64 = arith.constant 64 : index
    %23 = vector.load %arg20[%c0_18, %c64] : memref<8x96xf32, #tpu.memory_space<vmem>>, vector<8x8xf32>
    %24 = arith.truncf %23 : vector<8x8xf32> to vector<8x8xbf16>
    %cst_19 = arith.constant dense<0.000000e+00> : vector<8x8xf32>
    %25 = tpu.matmul %20, %22, %cst_19 {dimension_numbers = #tpu.dot_dimension_numbers<[1], [1], [0], [0], [0, 0, 1, 0], [], []>} : vector<8x8xbf16>, vector<8x8xbf16>, vector<8x8xf32> -> vector<8x8xf32>
    %cst_20 = arith.constant 0.353553385 : f32
    %26 = vector.broadcast %cst_20 : f32 to vector<8x8xf32>
    %27 = arith.mulf %25, %26 : vector<8x8xf32>
    %28 = vector.broadcast %18 : vector<1x8xf32> to vector<8x8xf32>
    %29 = arith.addf %27, %28 : vector<8x8xf32>
    %cst_21 = arith.constant dense<0xFF800000> : vector<8xf32>
    %30 = vector.multi_reduction <maximumf>, %29, %cst_21 [1] : vector<8x8xf32> to vector<8xf32>
    %31 = vector.shape_cast %30 : vector<8xf32> to vector<8x1xf32>
    %32 = vector.broadcast %31 : vector<8x1xf32> to vector<8x8xf32>
    %33 = arith.subf %29, %32 : vector<8x8xf32>
    %34 = math.exp %33 : vector<8x8xf32>
    %cst_22 = arith.constant dense<0.000000e+00> : vector<8xf32>
    %35 = vector.multi_reduction <add>, %34, %cst_22 [1] : vector<8x8xf32> to vector<8xf32>
    %36 = vector.shape_cast %35 : vector<8xf32> to vector<8x1xf32>
    %37 = tpu.reciprocal %36 {approx = true} : vector<8x1xf32> -> vector<8x1xf32>
    %38 = vector.broadcast %37 : vector<8x1xf32> to vector<8x8xf32>
    %39 = arith.mulf %34, %38 : vector<8x8xf32>
    %40 = arith.truncf %39 : vector<8x8xf32> to vector<8x8xbf16>
    %cst_23 = arith.constant dense<0.000000e+00> : vector<8x8xf32>
    %41 = tpu.matmul %40, %24, %cst_23 {dimension_numbers = #tpu.dot_dimension_numbers<[1], [0], [0], [1], [0, 0, 1, 1], [], []>} : vector<8x8xbf16>, vector<8x8xbf16>, vector<8x8xf32> -> vector<8x8xf32>
    %c0_24 = arith.constant 0 : index
    %c0_25 = arith.constant 0 : index
    %42 = vector.load %arg21[%c0_24, %c0_25] : memref<8x32xf32, #tpu.memory_space<vmem>>, vector<8x8xf32>
    tpu.vector_store %arg21[%c0_24, %c0_25], %41 {strides = array<i32>} : memref<8x32xf32, #tpu.memory_space<vmem>>, vector<8x8xf32>,
    %c0_26 = arith.constant 0 : index
    %c8 = arith.constant 8 : index
    %43 = vector.load %arg20[%c0_26, %c8] : memref<8x96xf32, #tpu.memory_space<vmem>>, vector<8x8xf32>
    %44 = arith.truncf %43 : vector<8x8xf32> to vector<8x8xbf16>
    %c0_27 = arith.constant 0 : index
    %c40 = arith.constant 40 : index
    %45 = vector.load %arg20[%c0_27, %c40] : memref<8x96xf32, #tpu.memory_space<vmem>>, vector<8x8xf32>
    %46 = arith.truncf %45 : vector<8x8xf32> to vector<8x8xbf16>
    %c0_28 = arith.constant 0 : index
    %c72 = arith.constant 72 : index
    %47 = vector.load %arg20[%c0_28, %c72] : memref<8x96xf32, #tpu.memory_space<vmem>>, vector<8x8xf32>
    %48 = arith.truncf %47 : vector<8x8xf32> to vector<8x8xbf16>
    %cst_29 = arith.constant dense<0.000000e+00> : vector<8x8xf32>
    %49 = tpu.matmul %44, %46, %cst_29 {dimension_numbers = #tpu.dot_dimension_numbers<[1], [1], [0], [0], [0, 0, 1, 0], [], []>} : vector<8x8xbf16>, vector<8x8xbf16>, vector<8x8xf32> -> vector<8x8xf32>
    %cst_30 = arith.constant 0.353553385 : f32
    %50 = vector.broadcast %cst_30 : f32 to vector<8x8xf32>
    %51 = arith.mulf %49, %50 : vector<8x8xf32>
    %52 = vector.broadcast %18 : vector<1x8xf32> to vector<8x8xf32>
    %53 = arith.addf %51, %52 : vector<8x8xf32>
    %cst_31 = arith.constant dense<0xFF800000> : vector<8xf32>
    %54 = vector.multi_reduction <maximumf>, %53, %cst_31 [1] : vector<8x8xf32> to vector<8xf32>
    %55 = vector.shape_cast %54 : vector<8xf32> to vector<8x1xf32>
    %56 = vector.broadcast %55 : vector<8x1xf32> to vector<8x8xf32>
    %57 = arith.subf %53, %56 : vector<8x8xf32>
    %58 = math.exp %57 : vector<8x8xf32>
    %cst_32 = arith.constant dense<0.000000e+00> : vector<8xf32>
    %59 = vector.multi_reduction <add>, %58, %cst_32 [1] : vector<8x8xf32> to vector<8xf32>
    %60 = vector.shape_cast %59 : vector<8xf32> to vector<8x1xf32>
    %61 = tpu.reciprocal %60 {approx = true} : vector<8x1xf32> -> vector<8x1xf32>
    %62 = vector.broadcast %61 : vector<8x1xf32> to vector<8x8xf32>
    %63 = arith.mulf %58, %62 : vector<8x8xf32>
    %64 = arith.truncf %63 : vector<8x8xf32> to vector<8x8xbf16>
    %cst_33 = arith.constant dense<0.000000e+00> : vector<8x8xf32>
    %65 = tpu.matmul %64, %48, %cst_33 {dimension_numbers = #tpu.dot_dimension_numbers<[1], [0], [0], [1], [0, 0, 1, 1], [], []>} : vector<8x8xbf16>, vector<8x8xbf16>, vector<8x8xf32> -> vector<8x8xf32>
    %c0_34 = arith.constant 0 : index
    %c8_35 = arith.constant 8 : index
    %66 = vector.load %arg21[%c0_34, %c8_35] : memref<8x32xf32, #tpu.memory_space<vmem>>, vector<8x8xf32>
    tpu.vector_store %arg21[%c0_34, %c8_35], %65 {strides = array<i32>} : memref<8x32xf32, #tpu.memory_space<vmem>>, vector<8x8xf32>,
    %c0_36 = arith.constant 0 : index
    %c16 = arith.constant 16 : index
    %67 = vector.load %arg20[%c0_36, %c16] : memref<8x96xf32, #tpu.memory_space<vmem>>, vector<8x8xf32>
    %68 = arith.truncf %67 : vector<8x8xf32> to vector<8x8xbf16>
    %c0_37 = arith.constant 0 : index
    %c48 = arith.constant 48 : index
    %69 = vector.load %arg20[%c0_37, %c48] : memref<8x96xf32, #tpu.memory_space<vmem>>, vector<8x8xf32>
    %70 = arith.truncf %69 : vector<8x8xf32> to vector<8x8xbf16>
    %c0_38 = arith.constant 0 : index
    %c80 = arith.constant 80 : index
    %71 = vector.load %arg20[%c0_38, %c80] : memref<8x96xf32, #tpu.memory_space<vmem>>, vector<8x8xf32>
    %72 = arith.truncf %71 : vector<8x8xf32> to vector<8x8xbf16>
    %cst_39 = arith.constant dense<0.000000e+00> : vector<8x8xf32>
    %73 = tpu.matmul %68, %70, %cst_39 {dimension_numbers = #tpu.dot_dimension_numbers<[1], [1], [0], [0], [0, 0, 1, 0], [], []>} : vector<8x8xbf16>, vector<8x8xbf16>, vector<8x8xf32> -> vector<8x8xf32>
    %cst_40 = arith.constant 0.353553385 : f32
    %74 = vector.broadcast %cst_40 : f32 to vector<8x8xf32>
    %75 = arith.mulf %73, %74 : vector<8x8xf32>
    %76 = vector.broadcast %18 : vector<1x8xf32> to vector<8x8xf32>
    %77 = arith.addf %75, %76 : vector<8x8xf32>
    %cst_41 = arith.constant dense<0xFF800000> : vector<8xf32>
    %78 = vector.multi_reduction <maximumf>, %77, %cst_41 [1] : vector<8x8xf32> to vector<8xf32>
    %79 = vector.shape_cast %78 : vector<8xf32> to vector<8x1xf32>
    %80 = vector.broadcast %79 : vector<8x1xf32> to vector<8x8xf32>
    %81 = arith.subf %77, %80 : vector<8x8xf32>
    %82 = math.exp %81 : vector<8x8xf32>
    %cst_42 = arith.constant dense<0.000000e+00> : vector<8xf32>
    %83 = vector.multi_reduction <add>, %82, %cst_42 [1] : vector<8x8xf32> to vector<8xf32>
    %84 = vector.shape_cast %83 : vector<8xf32> to vector<8x1xf32>
    %85 = tpu.reciprocal %84 {approx = true} : vector<8x1xf32> -> vector<8x1xf32>
    %86 = vector.broadcast %85 : vector<8x1xf32> to vector<8x8xf32>
    %87 = arith.mulf %82, %86 : vector<8x8xf32>
    %88 = arith.truncf %87 : vector<8x8xf32> to vector<8x8xbf16>
    %cst_43 = arith.constant dense<0.000000e+00> : vector<8x8xf32>
    %89 = tpu.matmul %88, %72, %cst_43 {dimension_numbers = #tpu.dot_dimension_numbers<[1], [0], [0], [1], [0, 0, 1, 1], [], []>} : vector<8x8xbf16>, vector<8x8xbf16>, vector<8x8xf32> -> vector<8x8xf32>
    %c0_44 = arith.constant 0 : index
    %c16_45 = arith.constant 16 : index
    %90 = vector.load %arg21[%c0_44, %c16_45] : memref<8x32xf32, #tpu.memory_space<vmem>>, vector<8x8xf32>
    tpu.vector_store %arg21[%c0_44, %c16_45], %89 {strides = array<i32>} : memref<8x32xf32, #tpu.memory_space<vmem>>, vector<8x8xf32>,
    %c0_46 = arith.constant 0 : index
    %c24 = arith.constant 24 : index
    %91 = vector.load %arg20[%c0_46, %c24] : memref<8x96xf32, #tpu.memory_space<vmem>>, vector<8x8xf32>
    %92 = arith.truncf %91 : vector<8x8xf32> to vector<8x8xbf16>
    %c0_47 = arith.constant 0 : index
    %c56 = arith.constant 56 : index
    %93 = vector.load %arg20[%c0_47, %c56] : memref<8x96xf32, #tpu.memory_space<vmem>>, vector<8x8xf32>
    %94 = arith.truncf %93 : vector<8x8xf32> to vector<8x8xbf16>
    %c0_48 = arith.constant 0 : index
    %c88 = arith.constant 88 : index
    %95 = vector.load %arg20[%c0_48, %c88] : memref<8x96xf32, #tpu.memory_space<vmem>>, vector<8x8xf32>
    %96 = arith.truncf %95 : vector<8x8xf32> to vector<8x8xbf16>
    %cst_49 = arith.constant dense<0.000000e+00> : vector<8x8xf32>
    %97 = tpu.matmul %92, %94, %cst_49 {dimension_numbers = #tpu.dot_dimension_numbers<[1], [1], [0], [0], [0, 0, 1, 0], [], []>} : vector<8x8xbf16>, vector<8x8xbf16>, vector<8x8xf32> -> vector<8x8xf32>
    %cst_50 = arith.constant 0.353553385 : f32
    %98 = vector.broadcast %cst_50 : f32 to vector<8x8xf32>
    %99 = arith.mulf %97, %98 : vector<8x8xf32>
    %100 = vector.broadcast %18 : vector<1x8xf32> to vector<8x8xf32>
    %101 = arith.addf %99, %100 : vector<8x8xf32>
    %cst_51 = arith.constant dense<0xFF800000> : vector<8xf32>
    %102 = vector.multi_reduction <maximumf>, %101, %cst_51 [1] : vector<8x8xf32> to vector<8xf32>
    %103 = vector.shape_cast %102 : vector<8xf32> to vector<8x1xf32>
    %104 = vector.broadcast %103 : vector<8x1xf32> to vector<8x8xf32>
    %105 = arith.subf %101, %104 : vector<8x8xf32>
    %106 = math.exp %105 : vector<8x8xf32>
    %cst_52 = arith.constant dense<0.000000e+00> : vector<8xf32>
    %107 = vector.multi_reduction <add>, %106, %cst_52 [1] : vector<8x8xf32> to vector<8xf32>
    %108 = vector.shape_cast %107 : vector<8xf32> to vector<8x1xf32>
    %109 = tpu.reciprocal %108 {approx = true} : vector<8x1xf32> -> vector<8x1xf32>
    %110 = vector.broadcast %109 : vector<8x1xf32> to vector<8x8xf32>
    %111 = arith.mulf %106, %110 : vector<8x8xf32>
    %112 = arith.truncf %111 : vector<8x8xf32> to vector<8x8xbf16>
    %cst_53 = arith.constant dense<0.000000e+00> : vector<8x8xf32>
    %113 = tpu.matmul %112, %96, %cst_53 {dimension_numbers = #tpu.dot_dimension_numbers<[1], [0], [0], [1], [0, 0, 1, 1], [], []>} : vector<8x8xbf16>, vector<8x8xbf16>, vector<8x8xf32> -> vector<8x8xf32>
    %c0_54 = arith.constant 0 : index
    %c24_55 = arith.constant 24 : index
    %114 = vector.load %arg21[%c0_54, %c24_55] : memref<8x32xf32, #tpu.memory_space<vmem>>, vector<8x8xf32>
    tpu.vector_store %arg21[%c0_54, %c24_55], %113 {strides = array<i32>} : memref<8x32xf32, #tpu.memory_space<vmem>>, vector<8x8xf32>,
    %c0_56 = arith.constant 0 : index
    %c0_57 = arith.constant 0 : index
    %115 = vector.load %arg21[%c0_56, %c0_57] : memref<8x32xf32, #tpu.memory_space<vmem>>, vector<8x32xf32>
    %116 = arith.truncf %115 : vector<8x32xf32> to vector<8x32xbf16>
    %c0_58 = arith.constant 0 : index
    %c0_59 = arith.constant 0 : index
    %c0_60 = arith.constant 0 : index
    %117 = vector.load %arg8[%c0_58, %c0_59, %c0_60] : memref<1x32x32xbf16, #tpu.memory_space<vmem>>, vector<1x32x32xbf16>
    %118 = vector.shape_cast %117 : vector<1x32x32xbf16> to vector<32x32xbf16>
    %cst_61 = arith.constant dense<0.000000e+00> : vector<8x32xf32>
    %119 = tpu.matmul %116, %118, %cst_61 {dimension_numbers = #tpu.dot_dimension_numbers<[1], [0], [0], [1], [0, 0, 1, 1], [], []>} : vector<8x32xbf16>, vector<32x32xbf16>, vector<8x32xf32> -> vector<8x32xf32>
    %c0_62 = arith.constant 0 : index
    %c0_63 = arith.constant 0 : index
    %c0_64 = arith.constant 0 : index
    %120 = vector.load %arg9[%c0_62, %c0_63, %c0_64] : memref<1x1x32xf32, #tpu.memory_space<vmem>>, vector<1x1x32xf32>
    %121 = vector.shape_cast %120 : vector<1x1x32xf32> to vector<1x32xf32>
    %122 = vector.broadcast %121 : vector<1x32xf32> to vector<8x32xf32>
    %123 = arith.addf %119, %122 : vector<8x32xf32>
    %124 = arith.addf %123, %3 : vector<8x32xf32>
    %c0_65 = arith.constant 0 : index
    %c0_66 = arith.constant 0 : index
    %c0_67 = arith.constant 0 : index
    %125 = vector.load %arg10[%c0_65, %c0_66, %c0_67] : memref<1x1x32xf32, #tpu.memory_space<vmem>>, vector<1x1x32xf32>
    %126 = vector.shape_cast %125 : vector<1x1x32xf32> to vector<1x32xf32>
    %c0_68 = arith.constant 0 : index
    %c0_69 = arith.constant 0 : index
    %c0_70 = arith.constant 0 : index
    %127 = vector.load %arg11[%c0_68, %c0_69, %c0_70] : memref<1x1x32xf32, #tpu.memory_space<vmem>>, vector<1x1x32xf32>
    %128 = vector.shape_cast %127 : vector<1x1x32xf32> to vector<1x32xf32>
    %cst_71 = arith.constant dense<0.000000e+00> : vector<8xf32>
    %129 = vector.multi_reduction <add>, %124, %cst_71 [1] : vector<8x32xf32> to vector<8xf32>
    %130 = vector.shape_cast %129 : vector<8xf32> to vector<8x1xf32>
    %cst_72 = arith.constant 3.200000e+01 : f32
    %131 = vector.broadcast %cst_72 : f32 to vector<8x1xf32>
    %132 = arith.divf %130, %131 : vector<8x1xf32>
    %133 = vector.broadcast %132 : vector<8x1xf32> to vector<8x32xf32>
    %134 = arith.subf %124, %133 : vector<8x32xf32>
    %135 = arith.mulf %134, %134 : vector<8x32xf32>
    %cst_73 = arith.constant dense<0.000000e+00> : vector<8xf32>
    %136 = vector.multi_reduction <add>, %135, %cst_73 [1] : vector<8x32xf32> to vector<8xf32>
    %137 = vector.shape_cast %136 : vector<8xf32> to vector<8x1xf32>
    %cst_74 = arith.constant 3.200000e+01 : f32
    %138 = vector.broadcast %cst_74 : f32 to vector<8x1xf32>
    %139 = arith.divf %137, %138 : vector<8x1xf32>
    %140 = vector.broadcast %132 : vector<8x1xf32> to vector<8x32xf32>
    %141 = arith.subf %124, %140 : vector<8x32xf32>
    %cst_75 = arith.constant 9.99999996E-13 : f32
    %142 = vector.broadcast %cst_75 : f32 to vector<8x1xf32>
    %143 = arith.addf %139, %142 : vector<8x1xf32>
    %144 = math.rsqrt %143 : vector<8x1xf32>
    %145 = vector.broadcast %144 : vector<8x1xf32> to vector<8x32xf32>
    %146 = arith.mulf %141, %145 : vector<8x32xf32>
    %147 = vector.broadcast %126 : vector<1x32xf32> to vector<8x32xf32>
    %148 = arith.mulf %146, %147 : vector<8x32xf32>
    %149 = vector.broadcast %128 : vector<1x32xf32> to vector<8x32xf32>
    %150 = arith.addf %148, %149 : vector<8x32xf32>
    %151 = arith.truncf %150 : vector<8x32xf32> to vector<8x32xbf16>
    %c0_76 = arith.constant 0 : index
    %c0_77 = arith.constant 0 : index
    %c0_78 = arith.constant 0 : index
    %152 = vector.load %arg15[%c0_76, %c0_77, %c0_78] : memref<1x1x32xf32, #tpu.memory_space<vmem>>, vector<1x1x32xf32>
    %153 = vector.shape_cast %152 : vector<1x1x32xf32> to vector<1x32xf32>
    %154 = vector.broadcast %153 : vector<1x32xf32> to vector<8x32xf32>
    %155 = arith.addf %150, %154 : vector<8x32xf32>
    %c0_79 = arith.constant 0 : index
    %c0_80 = arith.constant 0 : index
    %c0_81 = arith.constant 0 : index
    %156 = vector.load %arg12[%c0_79, %c0_80, %c0_81] : memref<1x32x64xbf16, #tpu.memory_space<vmem>>, vector<1x32x64xbf16>
    %157 = vector.shape_cast %156 : vector<1x32x64xbf16> to vector<32x64xbf16>
    %cst_82 = arith.constant dense<0.000000e+00> : vector<8x64xf32>
    %158 = tpu.matmul %151, %157, %cst_82 {dimension_numbers = #tpu.dot_dimension_numbers<[1], [0], [0], [1], [0, 0, 1, 1], [], []>} : vector<8x32xbf16>, vector<32x64xbf16>, vector<8x64xf32> -> vector<8x64xf32>
    %c0_83 = arith.constant 0 : index
    %c0_84 = arith.constant 0 : index
    %c0_85 = arith.constant 0 : index
    %159 = vector.load %arg13[%c0_83, %c0_84, %c0_85] : memref<1x1x64xf32, #tpu.memory_space<vmem>>, vector<1x1x64xf32>
    %160 = vector.shape_cast %159 : vector<1x1x64xf32> to vector<1x64xf32>
    %161 = vector.broadcast %160 : vector<1x64xf32> to vector<8x64xf32>
    %162 = arith.addf %158, %161 : vector<8x64xf32>
    %cst_86 = arith.constant 5.000000e-01 : f32
    %163 = vector.broadcast %cst_86 : f32 to vector<8x64xf32>
    %164 = arith.mulf %163, %162 : vector<8x64xf32>
    %cst_87 = arith.constant 4.471500e-02 : f32
    %165 = vector.broadcast %cst_87 : f32 to vector<8x64xf32>
    %166 = arith.mulf %165, %162 : vector<8x64xf32>
    %167 = arith.mulf %166, %162 : vector<8x64xf32>
    %168 = arith.mulf %167, %162 : vector<8x64xf32>
    %169 = arith.addf %162, %168 : vector<8x64xf32>
    %cst_88 = arith.constant 0.797884583 : f32
    %170 = vector.broadcast %cst_88 : f32 to vector<8x64xf32>
    %171 = arith.mulf %170, %169 : vector<8x64xf32>
    %172 = math.tanh %171 : vector<8x64xf32>
    %cst_89 = arith.constant 1.000000e+00 : f32
    %173 = vector.broadcast %cst_89 : f32 to vector<8x64xf32>
    %174 = arith.addf %173, %172 : vector<8x64xf32>
    %175 = arith.mulf %164, %174 : vector<8x64xf32>
    %176 = arith.truncf %175 : vector<8x64xf32> to vector<8x64xbf16>
    %c0_90 = arith.constant 0 : index
    %c0_91 = arith.constant 0 : index
    %c0_92 = arith.constant 0 : index
    %177 = vector.load %arg14[%c0_90, %c0_91, %c0_92] : memref<1x64x32xbf16, #tpu.memory_space<vmem>>, vector<1x64x32xbf16>
    %178 = vector.shape_cast %177 : vector<1x64x32xbf16> to vector<64x32xbf16>
    %cst_93 = arith.constant dense<0.000000e+00> : vector<8x32xf32>
    %179 = tpu.matmul %176, %178, %cst_93 {dimension_numbers = #tpu.dot_dimension_numbers<[1], [0], [0], [1], [0, 0, 1, 1], [], []>} : vector<8x64xbf16>, vector<64x32xbf16>, vector<8x32xf32> -> vector<8x32xf32>
    %180 = arith.addf %155, %179 : vector<8x32xf32>
    %c0_94 = arith.constant 0 : index
    %c0_95 = arith.constant 0 : index
    %c0_96 = arith.constant 0 : index
    %181 = vector.load %arg16[%c0_94, %c0_95, %c0_96] : memref<1x1x32xf32, #tpu.memory_space<vmem>>, vector<1x1x32xf32>
    %182 = vector.shape_cast %181 : vector<1x1x32xf32> to vector<1x32xf32>
    %c0_97 = arith.constant 0 : index
    %c0_98 = arith.constant 0 : index
    %c0_99 = arith.constant 0 : index
    %183 = vector.load %arg17[%c0_97, %c0_98, %c0_99] : memref<1x1x32xf32, #tpu.memory_space<vmem>>, vector<1x1x32xf32>
    %184 = vector.shape_cast %183 : vector<1x1x32xf32> to vector<1x32xf32>
    %cst_100 = arith.constant dense<0.000000e+00> : vector<8xf32>
    %185 = vector.multi_reduction <add>, %180, %cst_100 [1] : vector<8x32xf32> to vector<8xf32>
    %186 = vector.shape_cast %185 : vector<8xf32> to vector<8x1xf32>
    %cst_101 = arith.constant 3.200000e+01 : f32
    %187 = vector.broadcast %cst_101 : f32 to vector<8x1xf32>
    %188 = arith.divf %186, %187 : vector<8x1xf32>
    %189 = vector.broadcast %188 : vector<8x1xf32> to vector<8x32xf32>
    %190 = arith.subf %180, %189 : vector<8x32xf32>
    %191 = arith.mulf %190, %190 : vector<8x32xf32>
    %cst_102 = arith.constant dense<0.000000e+00> : vector<8xf32>
    %192 = vector.multi_reduction <add>, %191, %cst_102 [1] : vector<8x32xf32> to vector<8xf32>
    %193 = vector.shape_cast %192 : vector<8xf32> to vector<8x1xf32>
    %cst_103 = arith.constant 3.200000e+01 : f32
    %194 = vector.broadcast %cst_103 : f32 to vector<8x1xf32>
    %195 = arith.divf %193, %194 : vector<8x1xf32>
    %196 = vector.broadcast %188 : vector<8x1xf32> to vector<8x32xf32>
    %197 = arith.subf %180, %196 : vector<8x32xf32>
    %cst_104 = arith.constant 9.99999996E-13 : f32
    %198 = vector.broadcast %cst_104 : f32 to vector<8x1xf32>
    %199 = arith.addf %195, %198 : vector<8x1xf32>
    %200 = math.rsqrt %199 : vector<8x1xf32>
    %201 = vector.broadcast %200 : vector<8x1xf32> to vector<8x32xf32>
    %202 = arith.mulf %197, %201 : vector<8x32xf32>
    %203 = vector.broadcast %182 : vector<1x32xf32> to vector<8x32xf32>
    %204 = arith.mulf %202, %203 : vector<8x32xf32>
    %205 = vector.broadcast %184 : vector<1x32xf32> to vector<8x32xf32>
    %206 = arith.addf %204, %205 : vector<8x32xf32>
    %c0_105 = arith.constant 0 : index
    %c0_106 = arith.constant 0 : index
    %207 = vector.load %arg19[%c0_105, %c0_106] : memref<8x32xf32, #tpu.memory_space<vmem>>, vector<8x32xf32>
    tpu.vector_store %arg19[%c0_105, %c0_106], %206 {strides = array<i32>} : memref<8x32xf32, #tpu.memory_space<vmem>>, vector<8x32xf32>,
    %c1_i32 = arith.constant 1 : i32
    %208 = arith.cmpi eq, %arg1, %c1_i32 : i32
    %209 = arith.extui %208 : i1 to i32
    %c0_i32_107 = arith.constant 0 : i32
    %210 = arith.cmpi ne, %209, %c0_i32_107 : i32
    scf.if %210 {
      %211 = arith.truncf %206 : vector<8x32xf32> to vector<8x32xbf16>
      %c0_108 = arith.constant 0 : index
      %c0_109 = arith.constant 0 : index
      %c0_110 = arith.constant 0 : index
      %212 = vector.load %arg18[%c0_108, %c0_109, %c0_110] : memref<1x8x32xbf16, #tpu.memory_space<vmem>>, vector<1x8x32xbf16>
      %213 = vector.shape_cast %212 : vector<1x8x32xbf16> to vector<8x32xbf16>
      %214 = vector.shape_cast %211 : vector<8x32xbf16> to vector<1x8x32xbf16>
      tpu.vector_store %arg18[%c0_108, %c0_109, %c0_110], %214 {strides = array<i32>} : memref<1x8x32xbf16, #tpu.memory_space<vmem>>, vector<1x8x32xbf16>,
    } else {
    }
    return
  }
  func.func @transform_0(%arg0: i32, %arg1: i32) -> (i32, i32, i32) {
    %c0_i32 = arith.constant 0 : i32
    %c0_i32_0 = arith.constant 0 : i32
    %c0_i32_1 = arith.constant 0 : i32
    return %arg0, %c0_i32, %c0_i32_0 : i32, i32, i32
  }
  func.func @transform_1(%arg0: i32, %arg1: i32) -> (i32, i32, i32) {
    %c0_i32 = arith.constant 0 : i32
    %c0_i32_0 = arith.constant 0 : i32
    %c0_i32_1 = arith.constant 0 : i32
    return %arg0, %c0_i32, %c0_i32_0 : i32, i32, i32
  }
  func.func @transform_2(%arg0: i32, %arg1: i32) -> (i32, i32, i32) {
    %c0_i32 = arith.constant 0 : i32
    %c0_i32_0 = arith.constant 0 : i32
    %c0_i32_1 = arith.constant 0 : i32
    %c0_i32_2 = arith.constant 0 : i32
    return %c0_i32, %c0_i32_0, %c0_i32_1 : i32, i32, i32
  }
  func.func @transform_3(%arg0: i32, %arg1: i32) -> (i32, i32, i32) {
    %c0_i32 = arith.constant 0 : i32
    %c0_i32_0 = arith.constant 0 : i32
    %c0_i32_1 = arith.constant 0 : i32
    %c0_i32_2 = arith.constant 0 : i32
    return %c0_i32, %c0_i32_0, %c0_i32_1 : i32, i32, i32
  }
  func.func @transform_4(%arg0: i32, %arg1: i32) -> (i32, i32, i32) {
    %c0_i32 = arith.constant 0 : i32
    %c0_i32_0 = arith.constant 0 : i32
    %c0_i32_1 = arith.constant 0 : i32
    return %arg1, %c0_i32, %c0_i32_0 : i32, i32, i32
  }
  func.func @transform_5(%arg0: i32, %arg1: i32) -> (i32, i32, i32) {
    %c0_i32 = arith.constant 0 : i32
    %c0_i32_0 = arith.constant 0 : i32
    %c0_i32_1 = arith.constant 0 : i32
    return %arg1, %c0_i32, %c0_i32_0 : i32, i32, i32
  }
  func.func @transform_6(%arg0: i32, %arg1: i32) -> (i32, i32, i32) {
    %c0_i32 = arith.constant 0 : i32
    %c0_i32_0 = arith.constant 0 : i32
    %c0_i32_1 = arith.constant 0 : i32
    return %arg1, %c0_i32, %c0_i32_0 : i32, i32, i32
  }
  func.func @transform_7(%arg0: i32, %arg1: i32) -> (i32, i32, i32) {
    %c0_i32 = arith.constant 0 : i32
    %c0_i32_0 = arith.constant 0 : i32
    %c0_i32_1 = arith.constant 0 : i32
    return %arg1, %c0_i32, %c0_i32_0 : i32, i32, i32
  }
  func.func @transform_8(%arg0: i32, %arg1: i32) -> (i32, i32, i32) {
    %c0_i32 = arith.constant 0 : i32
    %c0_i32_0 = arith.constant 0 : i32
    %c0_i32_1 = arith.constant 0 : i32
    return %arg1, %c0_i32, %c0_i32_0 : i32, i32, i32
  }
  func.func @transform_9(%arg0: i32, %arg1: i32) -> (i32, i32, i32) {
    %c0_i32 = arith.constant 0 : i32
    %c0_i32_0 = arith.constant 0 : i32
    %c0_i32_1 = arith.constant 0 : i32
    return %arg1, %c0_i32, %c0_i32_0 : i32, i32, i32
  }
  func.func @transform_10(%arg0: i32, %arg1: i32) -> (i32, i32, i32) {
    %c0_i32 = arith.constant 0 : i32
    %c0_i32_0 = arith.constant 0 : i32
    %c0_i32_1 = arith.constant 0 : i32
    return %arg1, %c0_i32, %c0_i32_0 : i32, i32, i32
  }
  func.func @transform_11(%arg0: i32, %arg1: i32) -> (i32, i32, i32) {
    %c0_i32 = arith.constant 0 : i32
    %c0_i32_0 = arith.constant 0 : i32
    %c0_i32_1 = arith.constant 0 : i32
    return %arg1, %c0_i32, %c0_i32_0 : i32, i32, i32
  }
  func.func @transform_12(%arg0: i32, %arg1: i32) -> (i32, i32, i32) {
    %c0_i32 = arith.constant 0 : i32
    %c0_i32_0 = arith.constant 0 : i32
    %c0_i32_1 = arith.constant 0 : i32
    return %arg1, %c0_i32, %c0_i32_0 : i32, i32, i32
  }
  func.func @transform_13(%arg0: i32, %arg1: i32) -> (i32, i32, i32) {
    %c0_i32 = arith.constant 0 : i32
    %c0_i32_0 = arith.constant 0 : i32
    %c0_i32_1 = arith.constant 0 : i32
    return %arg1, %c0_i32, %c0_i32_0 : i32, i32, i32
  }
  func.func @transform_14(%arg0: i32, %arg1: i32) -> (i32, i32, i32) {
    %c0_i32 = arith.constant 0 : i32
    %c0_i32_0 = arith.constant 0 : i32
    %c0_i32_1 = arith.constant 0 : i32
    return %arg1, %c0_i32, %c0_i32_0 : i32, i32, i32
  }
  func.func @transform_15(%arg0: i32, %arg1: i32) -> (i32, i32, i32) {
    %c0_i32 = arith.constant 0 : i32
    %c0_i32_0 = arith.constant 0 : i32
    %c0_i32_1 = arith.constant 0 : i32
    return %arg1, %c0_i32, %c0_i32_0 : i32, i32, i32
  }
  func.func @transform_16(%arg0: i32, %arg1: i32) -> (i32, i32, i32) {
    %c0_i32 = arith.constant 0 : i32
    %c0_i32_0 = arith.constant 0 : i32
    %c0_i32_1 = arith.constant 0 : i32
    return %arg0, %c0_i32, %c0_i32_0 : i32, i32, i32
  }
}

module attributes {stable_mosaic.version = 11 : i64} {
  func.func @_pool_cls_kernel(%arg0: memref<2x32xbf16, #tpu.memory_space<vmem>>, %arg1: memref<32x32xbf16, #tpu.memory_space<vmem>>, %arg2: memref<1x32xf32, #tpu.memory_space<vmem>>, %arg3: memref<32x128xbf16, #tpu.memory_space<vmem>>, %arg4: memref<1x128xf32, #tpu.memory_space<vmem>>, %arg5: memref<2x128xf32, #tpu.memory_space<vmem>>) attributes {dimension_semantics = [], scalar_prefetch = 0 : i64, scratch_operands = 0 : i64, tpu.core_type = #tpu.core_type<tc>} {
    %c0 = arith.constant 0 : index
    %c0_0 = arith.constant 0 : index
    %0 = vector.load %arg0[%c0, %c0_0] : memref<2x32xbf16, #tpu.memory_space<vmem>>, vector<2x32xbf16>
    %c0_1 = arith.constant 0 : index
    %c0_2 = arith.constant 0 : index
    %1 = vector.load %arg1[%c0_1, %c0_2] : memref<32x32xbf16, #tpu.memory_space<vmem>>, vector<32x32xbf16>
    %cst = arith.constant dense<0.000000e+00> : vector<2x32xf32>
    %2 = tpu.matmul %0, %1, %cst {dimension_numbers = #tpu.dot_dimension_numbers<[1], [0], [0], [1], [0, 0, 1, 1], [], []>} : vector<2x32xbf16>, vector<32x32xbf16>, vector<2x32xf32> -> vector<2x32xf32>
    %c0_3 = arith.constant 0 : index
    %c0_4 = arith.constant 0 : index
    %3 = vector.load %arg2[%c0_3, %c0_4] : memref<1x32xf32, #tpu.memory_space<vmem>>, vector<1x32xf32>
    %4 = vector.broadcast %3 : vector<1x32xf32> to vector<2x32xf32>
    %5 = arith.addf %2, %4 : vector<2x32xf32>
    %6 = math.tanh %5 : vector<2x32xf32>
    %7 = arith.truncf %6 : vector<2x32xf32> to vector<2x32xbf16>
    %c0_5 = arith.constant 0 : index
    %c0_6 = arith.constant 0 : index
    %8 = vector.load %arg3[%c0_5, %c0_6] : memref<32x128xbf16, #tpu.memory_space<vmem>>, vector<32x128xbf16>
    %cst_7 = arith.constant dense<0.000000e+00> : vector<2x128xf32>
    %9 = tpu.matmul %7, %8, %cst_7 {dimension_numbers = #tpu.dot_dimension_numbers<[1], [0], [0], [1], [0, 0, 1, 1], [], []>} : vector<2x32xbf16>, vector<32x128xbf16>, vector<2x128xf32> -> vector<2x128xf32>
    %c0_8 = arith.constant 0 : index
    %c0_9 = arith.constant 0 : index
    %10 = vector.load %arg4[%c0_8, %c0_9] : memref<1x128xf32, #tpu.memory_space<vmem>>, vector<1x128xf32>
    %11 = vector.broadcast %10 : vector<1x128xf32> to vector<2x128xf32>
    %12 = arith.addf %9, %11 : vector<2x128xf32>
    %c0_10 = arith.constant 0 : index
    %c0_11 = arith.constant 0 : index
    %13 = vector.load %arg5[%c0_10, %c0_11] : memref<2x128xf32, #tpu.memory_space<vmem>>, vector<2x128xf32>
    tpu.vector_store %arg5[%c0_10, %c0_11], %12 {strides = array<i32>} : memref<2x128xf32, #tpu.memory_space<vmem>>, vector<2x128xf32>,
    return
  }
}

</mosaic_0001>

<bundles_post_ra>
// kernel: _lambda_.3
= control target key start
LH: loop header
LB: loop body
LE: loop exit
PB: predicated region body
PF: predicated region fallthrough
CT: control target
= control target key end

     0   :  { %vm42_vm0 = vcmask 261120   ;;  %s182_s1 = inlined_call_operand.vmem [shape: bf16[32,32], index: 1, kind: input, shape index: {}]   ;;  %s183_s2 = inlined_call_operand.vmem [shape: f32[1,32], index: 2, kind: input, shape index: {}]   ;;  %s184_s0 = inlined_call_operand.vmem [shape: bf16[2,32], index: 0, kind: input, shape index: {}]   ;;  %s185_s4 = inlined_call_operand.vmem [shape: f32[1,128], index: 4, kind: input, shape index: {}]   ;;  %s186_s3 = inlined_call_operand.vmem [shape: bf16[32,128], index: 3, kind: input, shape index: {}]   ;;  %s187_s5 = inlined_call_operand.vmem [shape: f32[2,128], index: 5, kind: output, shape index: {}]  }
   0x1   :  { %v121_v0 = vld [vmem:[%s182_s1 + $0x8] sm:$0xff]  ;;  %v120_v1 = vld [vmem:[%s182_s1] sm:$0xff] }
   0x2   :  { %52 = vmatpush.bf16.msra.mxu0 %v121_v0  ;;  %v21_v2 = vld [vmem:[%s184_s0] sm:$0x1]  ;;  %v123_v3 = vld [vmem:[%s186_s3 + $0x8] sm:$0xff] }
   0x3   :  { %90 = vmatpush.bf16.msra.mxu1 %v123_v3  ;;  %v122_v4 = vld [vmem:[%s186_s3] sm:$0xff] }
   0x4   :  { %v124_v5 = vld [vmem:[%s183_s2] ss:$0 sm:$0xff] }
   0x5   :  { %v125_v11 = vld [vmem:[%s185_s4] ss:$0 sm:$0xff] }
   0x6   :  { %53 = vmatpush.bf16.msra.mxu0 %v120_v1 }
   0x7   :  { %91 = vmatpush.bf16.msra.mxu1 %v122_v4 }
   0x9   :  { %110 = vmatmul.msk.bf16.vlgmr.msra.gmra.mxu0 %vm42_vm0, %v21_v2 }
  0x86   :  { %v55_v6 = vpop.f32.mrf.mxu0 }
  0x87   :  { %v56_v7 = vadd.f32 %v124_v5, %v55_v6 }
  0x89   :  { %126 = vtanh.f32 %v56_v7 }
  0x8e   :  { %v57_v8 = vpop.f32.mrf.mxu0 }
  0x8f   :  { %v127_v9 = vpop.eup %126 }
  0x90   :  { %v60_v10 = vpack.c.bf16 %v127_v9, %v127_v9 }
  0x92   :  { %119 = vmatmul.msk.bf16.vlgmr.msra.gmra.mxu1 %vm42_vm0, %v60_v10 }
 0x10f   :  { %v93_v12 = vpop.f32.mrf.mxu1 }
 0x110   :  { %v94_v13 = vadd.f32 %v125_v11, %v93_v12 }
 0x112   :  { %97 = vst [vmem:[%s187_s5] sm:$0x3] %v94_v13 }
 0x117   :  { %v95_v14 = vpop.f32.mrf.mxu1 }

// kernel: _lambda_.2
= control target key start
LH: loop header
LB: loop body
LE: loop exit
PB: predicated region body
PF: predicated region fallthrough
CT: control target
= control target key end

     0   :  { %s1826_s21 = smov 0   ;;  %s1828_s22 = smov 0   ;;  %s2071_s0 = inlined_call_operand.vmem [shape: bf16[2,8,32], index: 0, kind: input, shape index: {}]   ;;  %s2072_s1 = inlined_call_operand.vmem [shape: f32[2,1,8], index: 1, kind: input, shape index: {}]   ;;  %s2073_s2 = inlined_call_operand.vmem [shape: f32[1,1,32], index: 2, kind: input, shape index: {}]   ;;  %s2074_s3 = inlined_call_operand.vmem [shape: f32[1,1,32], index: 3, kind: input, shape index: {}]   ;;  %s2075_s4 = inlined_call_operand.vmem [shape: bf16[2,32,96], index: 4, kind: input, shape index: {}]   ;;  %s2076_s5 = inlined_call_operand.vmem [shape: f32[2,1,96], index: 5, kind: input, shape index: {}]   ;;  %s2077_s6 = inlined_call_operand.vmem [shape: bf16[2,32,32], index: 6, kind: input, shape index: {}]   ;;  %s2078_s7 = inlined_call_operand.vmem [shape: f32[2,1,32], index: 7, kind: input, shape index: {}, may-alias: {7,9,13,15}]   ;;  %s2079_s8 = inlined_call_operand.vmem [shape: f32[2,1,32], index: 8, kind: input, shape index: {}, may-alias: {8,14}]   ;;  %s2080_s9 = inlined_call_operand.vmem [shape: f32[2,1,32], index: 9, kind: input, shape index: {}, may-alias: {7,9,13,15}]   ;;  %s2081_s10 = inlined_call_operand.vmem [shape: bf16[2,32,64], index: 10, kind: input, shape index: {}]   ;;  %s2082_s11 = inlined_call_operand.vmem [shape: f32[2,1,64], index: 11, kind: input, shape index: {}]   ;;  %s2083_s12 = inlined_call_operand.vmem [shape: bf16[2,64,32], index: 12, kind: input, shape index: {}]   ;;  %s2084_s13 = inlined_call_operand.vmem [shape: f32[2,1,32], index: 13, kind: input, shape index: {}, may-alias: {7,9,13,15}]   ;;  %s2085_s14 = inlined_call_operand.vmem [shape: f32[2,1,32], index: 14, kind: input, shape index: {}, may-alias: {8,14}]   ;;  %s2086_s15 = inlined_call_operand.vmem [shape: f32[2,1,32], index: 15, kind: input, shape index: {}, may-alias: {7,9,13,15}]   ;;  %s2087_s16 = inlined_call_operand.vmem [shape: bf16[2,8,32], index: 16, kind: output, shape index: {}]  }
   0x1   :  { %2093 = sst [smem:[#allocation12_spill]] %s2071_s0  ;;  %s1830_s23 = smov 0  }
   0x2   :  { %2094 = sst [smem:[#allocation13_spill]] %s2072_s1  ;;  %s1832_s24 = smov 0  }
   0x3   :  { %2095 = sst [smem:[#allocation14_spill]] %s2073_s2  ;;  %s1834_s25 = smov 0  }
   0x4   :  { %2096 = sst [smem:[#allocation15_spill]] %s2074_s3 }
   0x5   :  { %2097 = sst [smem:[#allocation16_spill]] %s2075_s4 }
   0x6   :  { %2098 = sst [smem:[#allocation17_spill]] %s2077_s6 }
   0x7   :  { %2099 = sst [smem:[#allocation18_spill]] %s2081_s10 }
   0x8   :  { %2100 = sst [smem:[#allocation19_spill]] %s2082_s11 }
   0x9   :  { %2101 = sst [smem:[#allocation20_spill]] %s2086_s15 }
   0xa   :  { %2102 = sst [smem:[#allocation21_spill]] %s2087_s16 }
   0xb LB: > { %2103 = sst [smem:[#allocation5_spill]] %s1707_s21  ;;  %s35_s26 = sadd.s32 1, %s1715_s23  ;;  %s1723_s25 = sphi %s1834_s25, %s26_s25   ;;  %s1719_s24 = sphi %s1832_s24, %s2136_s24   ;;  %s1715_s23 = sphi %s1830_s23, %s2135_s23   ;;  %s1711_s22 = sphi %s1828_s22, %s2134_s22   ;;  %s1707_s21 = sphi %s1826_s21, %s2133_s21  }
   0xc   : > { %2104 = sst [smem:[#allocation6_spill]] %s1715_s23  ;;  %s38_s27 = sadd.s32 1, %s1719_s24 }
   0xd   : > { %2105 = sst [smem:[#allocation7_spill]] %s1719_s24  ;;  %p36_p0 = scmp.ge.s32.totalorder %s35_s26, 2 }
   0xe   : > { %2106 = sst [smem:[#allocation8_spill]] %s1723_s25  ;;  %p1510_p1 = scmp.ge.s32.totalorder %s1723_s25, 1 }
   0xf   : > { %p585_p2 = scmp.lt.s32.totalorder %s1723_s25, 5  ;;  %s2138_s26 = smov (%p36_p0, %s35_s26), 0 }
  0x10   : > { %2107 = sst [smem:[#allocation9_spill]] %s2138_s26  ;;  %s2140_s27 = smov (!%p36_p0, %s38_s27), %s1719_s24 }
  0x11   : > { %p586_p3 = pnand %p1510_p1, %p585_p2  ;;  %p40_p4 = scmp.ge.s32.totalorder %s2140_s27, 2 }
  0x13   : > { %s2142_s27 = smov (%p40_p4, %s2140_s27), 0  ;;  %589 = sbr.rel (%p586_p3) target bundleno = 2239 (0x8bf), region = 84 }
  0x14   : > { %2108 = sst [smem:[#allocation10_spill]] %s2142_s27 }
  0x18   : > { %p680_p5 = scmp.lt.s32.totalorder %s1711_s22, 1  ;;  %p687_p6 = scmp.lt.s32.totalorder %s1707_s21, 1 }
  0x19   : > { %s2111_s20 = sld [smem:[#allocation12_spill]] }
  0x1a   : > { %s2144_s22 = smov (!%p680_p5, %s1711_s22), 1  ;;  %s2112_s4 = sld [smem:[#allocation16_spill]] }
  0x1b   : > { %2109 = sst [smem:[#allocation11_spill]] %s2144_s22  ;;  %s1511_s29 = sshll.u32 %s2144_s22, 2 }
  0x1c   : > { %s1862_s28 = scalar_select %p687_p6, %s1707_s21, 1 }
  0x1d   : > { %s2113_s6 = sld [smem:[#allocation17_spill]] }
  0x1e   : > { %s1577_s26 = sshll.u32 %s1862_s28, 4  ;;  %s2114_s10 = sld [smem:[#allocation18_spill]] }
  0x1f   : > { %s683_s27 = scalar_lea.vmem %s2111_s20, %s1511_s29  ;;  %s724_s18 = scalar_lea.vmem %s2084_s13, %s1862_s28 }
  0x20   : > { %s1876_s25 = scalar_lea.vmem %s2112_s4, %s1577_s26  ;;  %s727_s22 = scalar_lea.vmem %s2085_s14, %s1862_s28 }
  0x21   : > { %s2116_s4 = sld [smem:[#allocation20_spill]] }
  0x22   : > { %s2117_s21 = sld [smem:[#allocation21_spill]] }
  0x23   : > { %s1885_s30 = scalar_lea.vmem %s2113_s6, %s1577_s26  ;;  %s1580_s6 = sshll.u32 %s1862_s28, 5 }
  0x24   : > { %s1902_s3 = scalar_lea.vmem %s2114_s10, %s1577_s26  ;;  %s1916_s1 = scalar_lea.vmem %s2083_s12, %s1580_s6 }
  0x25   : > { %s2118_s17 = sld [smem:[#allocation5_spill]] }
  0x27   : > { %s730_s10 = scalar_lea.vmem %s2116_s4, %s1862_s28 }
  0x28   : > { %s1929_s11 = scalar_lea.vmem %s2117_s21, %s1511_s29 }
  0x2b   : > { %p1521_p7 = scmp.ne.s32.totalorder %s2118_s17, 0 }
  0x2c   : > { %s2119_s21 = sld [smem:[#allocation14_spill]] (!%p1521_p7) }
  0x2d   : > { %739 = sbr.rel (%p1521_p7) target bundleno = 322 (0x142), region = 88  ;;  %s2120_s0 = sld [smem:[#allocation15_spill]] (!%p1521_p7) }
  0x32   : > { %v740_v0 = vld [vmem:[%s683_s27] sm:$0xf]  ;;  %vm744_vm0 = vcmask 261120   ;;  %v1725_v3 = vmov 32.0  }
  0x33   : > { %v741_v1 = vunpack.c.l.bf16 %v740_v0  ;;  %1649 = vrcp.f32 %v1725_v3  ;;  %v1647_v24 = vld [vmem:[%s2119_s21] ss:$0 sm:$0xff] }
  0x34   : > { %v1648_v26 = vld [vmem:[%s2120_s0] ss:$0 sm:$0xff] }
  0x35   : > { %v745_v2 = vsel %vm744_vm0, %v741_v1, 0.0 }
  0x36   : > { %746 = vadd.xlane.f32.xlu0 %v745_v2 }
  0x39   : > { %v1650_v4 = vpop.eup %1649 }
  0x3a   : > { %v749_v5 = vmul.f32 32.0, %v1650_v4  ;;  %vm753_vm1 = vweird.f32 %v1650_v4 }
  0x3c   : > { %v750_v6 = vsub.f32 1.0, %v749_v5 }
  0x3e   : > { %v751_v7 = vmul.f32 %v1650_v4, %v750_v6 }
  0x40   : > { %v752_v8 = vadd.f32 %v1650_v4, %v751_v7 }
  0x42   : > { %v754_v9 = vsel %vm753_vm1, %v1650_v4, %v752_v8 }
  0xa9   : > { %v747_v10 = vpop.xlane.xlu0 %746 }
  0xaa   : > { %v755_v11 = vmul.f32 %v754_v9, %v747_v10 }
  0xac   : > { %v756_v12 = vsub.f32 %v741_v1, %v755_v11 }
  0xae   : > { %v757_v13 = vmul.f32 %v756_v12, %v756_v12 }
  0xb0   : > { %v758_v14 = vsel %vm744_vm0, %v757_v13, 0.0 }
  0xb1   : > { %759 = vadd.xlane.f32.xlu0 %v758_v14 }
 0x124   : > { %v760_v15 = vpop.xlane.xlu0 %759 }
 0x125   : > { %v761_v16 = vmul.f32 %v760_v15, %v754_v9 }
 0x127   : > { %v762_v17 = vadd.f32 1e-12, %v761_v16 }
 0x129   : > { %1651 = vrsqrt.f32 %v762_v17  ;;  %vm769_vm3 = vweird.f32 %v762_v17 }
 0x12f   : > { %v1652_v18 = vpop.eup %1651 }
 0x130   : > { %v764_v19 = vmul.f32 %v1652_v18, %v762_v17  ;;  %vm770_vm2 = vweird.f32 %v1652_v18 }
 0x131   : > { %vm771_vm4 = vmor %vm769_vm3, %vm770_vm2 }
 0x132   : > { %v765_v20 = vmul.f32 %v1652_v18, %v764_v19 }
 0x134   : > { %v766_v21 = vmul.f32 0.5, %v765_v20 }
 0x136   : > { %v767_v22 = vsub.f32 1.5, %v766_v21 }
 0x138   : > { %v768_v23 = vmul.f32 %v1652_v18, %v767_v22 }
 0x13a   : > { %v772_v25 = vsel %vm771_vm4, %v1652_v18, %v768_v23 }
 0x13b   : > { %v773_v27 = vmul.f32 %v772_v25, %v756_v12 }
 0x13d   : > { %v777_v28 = vmul.f32 %v1647_v24, %v773_v27 }
 0x13f   : > { %v781_v29 = vadd.f32 %v1648_v26, %v777_v28 }
 0x141   : > { %782 = vst.msk [vmem:[#allocation2] sm:$0xff] %vm744_vm0, %v781_v29 }
 0x142 PF: > { %v1582_v30 = vld [vmem:[%s1876_s25 + $0x8] sm:$0xff]  ;;  %v1581_v31 = vld [vmem:[%s1876_s25] sm:$0xff]  ;;  %vm805_vm5 = vcmask 261120   ;;  %s2121_s23 = scalar_lea.vmem %s2076_s5, %s1862_s28  ;;  %vm822_vm6 = vcmask 785408   ;;  %s1726_s25 = smov 104   ;;  %vm832_vm7 = vcmask 64512  }
 0x143   : > { %815 = vmatpush.bf16.msra.mxu0 %v1582_v30  ;;  %v1653_v34 = vld [vmem:[%s2121_s23] ss:$0 sm:$0xff]  ;;  %s1727_s24 = smov 120   ;;  %s1728_s26 = smov 96   ;;  %vm874_vm8 = vcmask 1043456   ;;  %vm957_vm9 = vcmask 130112  }
 0x144   : > { %s1729_s2 = smov 80   ;;  %s1730_s15 = smov 72   ;;  %vm1024_vm10 = vcmask 195712   ;;  %vm1091_vm11 = vcmask 261312   ;;  %vm1255_vm0 = vcmask 523264  }
 0x145   : > { %s1731_s16 = smov 88   ;;  %s1732_s17 = smov 112  }
 0x146   : > { %s2122_s4 = sld [smem:[#allocation11_spill]]  ;;  %s1733_s0 = smov 64  }
 0x147   : > { %816 = vmatpush.bf16.msra.mxu0 %v1581_v31  ;;  %s2123_s27 = sld [smem:[#allocation13_spill]]  ;;  %s1734_s19 = smov 40  }
 0x148   : > { %v1943_v32 = vld [vmem:[#allocation2] sm:$0xff]  ;;  %s1735_s20 = smov 56   ;;  %s1736_s23 = smov 48  }
 0x149   : > { %v784_v33 = vpack.c.bf16 %v1943_v32, %v1943_v32  ;;  %s2127_s21 = scalar_lea.vmem %s2080_s9, %s1862_s28 }
 0x14b   : > { %1530 = vmatmul.msk.bf16.vlgmr.msra.gmra.mxu0 %vm805_vm5, %v784_v33 }
 0x14d   : > { %s2124_s29 = scalar_lea.vmem %s2123_s27, %s2122_s4 }
 0x14e   : > { %v824_v51 = vld [vmem:[%s2124_s29] sm:$0x1] }
 0x14f   : > { %v825_v52 = vsub.f32 1.0, %v824_v51 }
 0x151   : > { %v826_v53 = vmul.f32 -10000.0, %v825_v52 }
 0x153   : > { %v854_v54 = vperm.slane %v826_v53, 0 }
 0x1c8   : > { %v818_v35 = vpop.f32.mrf.mxu0 }
 0x1c9   : > { %v819_v36 = vadd.f32 %v1653_v34, %v818_v35 }
 0x1cb   : > { %823 = vst.msk [vmem:[#allocation3] sm:$0xff] %vm822_vm6, %v819_v36 }
 0x1d0   : > { %v820_v37 = vpop.f32.mrf.mxu0 }
 0x1d2   : > { %v1026_v38 = vld [vmem:[#allocation3] sm:$0xff] }
 0x1d3   : > { %v1953_v39 = vpack.c.bf16 %v1026_v38, %v1026_v38 }
 0x1d5   : > { %1029 = vrot.lane.b32.xlu2 %v1953_v39, %s1726_s25  ;;  %895 = vrot.lane.b32.xlu1 %v1953_v39, %s1727_s24  ;;  %s1737_s25 = smov 8   ;;  %s1738_s24 = smov 16  }
 0x1d6   : > { %830 = vrot.lane.b32.xlu0 %v1953_v39, %s1728_s26  ;;  %s1739_s26 = smov 24  }
 0x1dd   : > { %964 = vrot.lane.b32.xlu2 %v1953_v39, %s1729_s2  ;;  %1031 = vrot.lane.b32.xlu1 %v1953_v39, %s1730_s15  ;;  %s2131_s2 = sld [smem:[#allocation5_spill]] }
 0x1de   : > { %897 = vrot.lane.b32.xlu0 %v1953_v39, %s1731_s16  ;;  %s2125_s16 = scalar_lea.vmem %s2078_s7, %s1862_s28 }
 0x1e3   : > { %p1574_p8 = scmp.ne.s32.totalorder %s2131_s2, 1 }
 0x1e6   : > { %962 = vrot.lane.b32.xlu0 %v1953_v39, %s1732_s17  ;;  %s2126_s17 = scalar_lea.vmem %s2079_s8, %s1862_s28 }
 0x22f   : > { %v1030_v40 = vpop.permute.xlu2 %1029 }
 0x237   : > { %v965_v41 = vpop.permute.xlu2 %964 }
 0x238   : > { %v970_v42 = vsel %vm832_vm7, %v965_v41, 0 }
 0x239   : > { %979 = vmatpush.bf16.xpose.msrb.mxu0 %v970_v42 }
 0x247   : > { %v896_v43 = vpop.permute.xlu1 %895 }
 0x248   : > { %v831_v44 = vpop.permute.xlu0 %830 }
 0x249   : > { %v837_v45 = vsel %vm832_vm7, %v831_v44, 0 }
 0x24a   : > { %846 = vmatpush.bf16.xpose.msra.mxu1 %v837_v45 }
 0x24f   : > { %v1032_v46 = vpop.permute.xlu1 %1031 }
 0x250   : > { %v898_v47 = vpop.permute.xlu0 %897  ;;  %v1037_v48 = vsel %vm832_vm7, %v1032_v46, 0 }
 0x251   : > { %1531 = vmatmul.msk.bf16.vlgmr.msra.gmra.mxu1 %vm832_vm7, %v1953_v39  ;;  %v903_v49 = vsel %vm832_vm7, %v898_v47, 0 }
 0x252   : > { %912 = vmatpush.bf16.xpose.msra.mxu3 %v903_v49 }
 0x258   : > { %v963_v50 = vpop.permute.xlu0 %962 }
 0x259   : > { %1533 = vmatmul.msk.bf16.vlgmr.msra.gmra.mxu3 %vm832_vm7, %v896_v43  ;;  %1535 = vmatmul.msk.bf16.vlgmr.msrb.gmra.mxu0 %vm832_vm7, %v963_v50 }
 0x25a   : > { %1046 = vmatpush.bf16.xpose.msrb.mxu3 %v1037_v48 }
 0x269   : > { %1537 = vmatmul.msk.bf16.vlgmr.msrb.gmra.mxu3 %vm832_vm7, %v1030_v40 }
 0x2ce   : > { %v848_v55 = vpop.f32.mrf.mxu1 }
 0x2cf   : > { %v852_v56 = vmul.f32 0.35355338, %v848_v55 }
 0x2d1   : > { %v856_v57 = vadd.f32 %v854_v54, %v852_v56 }
 0x2d3   : > { %v857_v58 = vsel %vm832_vm7, %v856_v57, -inf }
 0x2d4   : > { %858 = vmax.xlane.f32.xlu1 %v857_v58 }
 0x2d6   : > { %v850_v59 = vpop.f32.mrf.mxu1  ;;  %v981_v60 = vpop.f32.mrf.mxu0 }
 0x2d7   : > { %v985_v1 = vmul.f32 0.35355338, %v981_v60 }
 0x2d9   : > { %v986_v4 = vadd.f32 %v985_v1, %v854_v54  ;;  %v1583_v1 = vld [vmem:[%s1885_s30] sm:$0xff] }
 0x2db   : > { %v987_v5 = vsel %vm832_vm7, %v986_v4, -inf }
 0x2dc   : > { %v914_v61 = vpop.f32.mrf.mxu3 }
 0x2dd   : > { %v918_v62 = vmul.f32 0.35355338, %v914_v61 }
 0x2de   : > { %v983_v63 = vpop.f32.mrf.mxu0 }
 0x2df   : > { %v919_v0 = vadd.f32 %v918_v62, %v854_v54 }
 0x2e1   : > { %v920_v2 = vsel %vm832_vm7, %v919_v0, -inf }
 0x2e2   : > { %921 = vmax.xlane.f32.xlu2 %v920_v2 }
 0x2e4   : > { %v916_v3 = vpop.f32.mrf.mxu3 }
 0x2ea   : > { %988 = vmax.xlane.f32.xlu2 %v987_v5 }
 0x2ec   : > { %v1048_v6 = vpop.f32.mrf.mxu3 }
 0x2ed   : > { %v1052_v7 = vmul.f32 0.35355338, %v1048_v6 }
 0x2ef   : > { %v1053_v8 = vadd.f32 %v1052_v7, %v854_v54  ;;  %v1654_v7 = vld [vmem:[%s2125_s16] ss:$0 sm:$0xff] }
 0x2f1   : > { %v1054_v9 = vsel %vm832_vm7, %v1053_v8, -inf }
 0x2f2   : > { %1055 = vmax.xlane.f32.xlu0 %v1054_v9 }
 0x2f4   : > { %v1050_v10 = vpop.f32.mrf.mxu3 }
 0x302   : > { %869 = vrot.lane.b32.xlu2 %v1953_v39, %s1733_s0  ;;  %s2128_s0 = sld [smem:[#allocation19_spill]] }
 0x30a   : > { %1066 = vrot.lane.b32.xlu2 %v1953_v39, %s1734_s19  ;;  %s2129_s19 = scalar_lea.vmem %s2128_s0, %s1862_s28 }
 0x347   : > { %v859_v11 = vpop.xlane.xlu1 %858 }
 0x348   : > { %v860_v12 = vsub.f32 %v856_v57, %v859_v11 }
 0x34a   : > { %v861_v13 = vmul.f32 1.442695, %v860_v12 }
 0x34c   : > { %1661 = vpow2.f32 %v861_v13  ;;  %v1740_v13 = vmov 32.0  }
 0x352   : > { %v1662_v14 = vpop.eup %1661 }
 0x353   : > { %v863_v15 = vsel %vm832_vm7, %v1662_v14, 0.0 }
 0x354   : > { %864 = vadd.xlane.f32.xlu1 %v863_v15 }
 0x355   : > { %v922_v16 = vpop.xlane.xlu2 %921 }
 0x356   : > { %v923_v19 = vsub.f32 %v919_v0, %v922_v16  ;;  %v1584_v0 = vld [vmem:[%s1885_s30 + $0x8] sm:$0xff] }
 0x357   : > { %1124 = vmatpush.bf16.msra.mxu0 %v1584_v0 }
 0x358   : > { %v924_v21 = vmul.f32 1.442695, %v923_v19 }
 0x35b   : > { %1125 = vmatpush.bf16.msra.mxu0 %v1583_v1 }
 0x35d   : > { %v989_v17 = vpop.xlane.xlu2 %988 }
 0x35e   : > { %v990_v18 = vsub.f32 %v986_v4, %v989_v17 }
 0x360   : > { %v991_v20 = vmul.f32 1.442695, %v990_v18 }
 0x362   : > { %1663 = vpow2.f32 %v991_v20 }
 0x363   : > { %1665 = vpow2.f32 %v924_v21 }
 0x365   : > { %v870_v22 = vpop.permute.xlu2 %869  ;;  %v1056_v23 = vpop.xlane.xlu0 %1055 }
 0x366   : > { %v876_v24 = vsel %vm874_vm8, %v870_v22, 0  ;;  %v1057_v26 = vsub.f32 %v1053_v8, %v1056_v23 }
 0x367   : > { %885 = vmatpush.bf16.msra.mxu2 %v876_v24  ;;  %v1586_v24 = vld [vmem:[%s1902_s3 + $0x8] sm:$0xff] }
 0x368   : > { %v1664_v25 = vpop.eup %1663  ;;  %v1058_v28 = vmul.f32 1.442695, %v1057_v26 }
 0x369   : > { %v993_v27 = vsel %vm832_vm7, %v1664_v25, 0.0  ;;  %v1666_v29 = vpop.eup %1665 }
 0x36a   : > { %994 = vadd.xlane.f32.xlu0 %v993_v27  ;;  %1667 = vpow2.f32 %v1058_v28  ;;  %v926_v30 = vsel %vm832_vm7, %v1666_v29, 0.0 }
 0x36d   : > { %932 = vrot.lane.b32.xlu1 %v1953_v39, %s1735_s20  ;;  %v1067_v40 = vpop.permute.xlu2 %1066 }
 0x36e   : > { %v1072_v43 = vsel %vm874_vm8, %v1067_v40, 0 }
 0x370   : > { %v1668_v31 = vpop.eup %1667 }
 0x371   : > { %v1060_v33 = vsel %vm832_vm7, %v1668_v31, 0.0 }
 0x372   : > { %927 = vadd.xlane.f32.xlu0 %v926_v30 }
 0x37a   : > { %1061 = vadd.xlane.f32.xlu0 %v1060_v33 }
 0x38e   : > { %999 = vrot.lane.b32.xlu0 %v1953_v39, %s1736_s23 }
 0x3c7   : > { %v865_v34 = vpop.xlane.xlu1 %864 }
 0x3c8   : > { %1669 = vrcp.f32 %v865_v34 }
 0x3ce   : > { %v1670_v35 = vpop.eup %1669 }
 0x3cf   : > { %v867_v36 = vmul.f32 %v1670_v35, %v1662_v14 }
 0x3d1   : > { %v868_v37 = vpack.c.bf16 %v867_v36, %v867_v36  ;;  %v1655_v36 = vld [vmem:[%s2126_s17] ss:$0 sm:$0xff] }
 0x3d3   : > { %1532 = vmatmul.msk.bf16.vlgmr.msra.gmra.mxu2 %vm832_vm7, %v868_v37 }
 0x3dd   : > { %v995_v38 = vpop.xlane.xlu0 %994 }
 0x3df   : > { %v933_v41 = vpop.permute.xlu1 %932 }
 0x3e0   : > { %v938_v42 = vsel %vm874_vm8, %v933_v41, 0 }
 0x3e1   : > { %947 = vmatpush.bf16.msrb.mxu2 %v938_v42 }
 0x3e5   : > { %1081 = vmatpush.bf16.msra.mxu2 %v1072_v43  ;;  %v928_v44 = vpop.xlane.xlu0 %927 }
 0x3e6   : > { %1671 = vrcp.f32 %v928_v44  ;;  %v1590_v44 = vld [vmem:[%s1916_s1 + $0x18] sm:$0xff] }
 0x3e7   : > { %1263 = vmatpush.bf16.msra.mxu3 %v1590_v44 }
 0x3ec   : > { %v1672_v45 = vpop.eup %1671 }
 0x3ed   : > { %v930_v39 = vmul.f32 %v1672_v45, %v1666_v29  ;;  %v1062_v46 = vpop.xlane.xlu0 %1061  ;;  %v1589_v45 = vld [vmem:[%s1916_s1 + $0x10] sm:$0xff] }
 0x3ee   : > { %1673 = vrcp.f32 %v1062_v46  ;;  %1264 = vmatpush.bf16.msra.mxu3 %v1589_v45  ;;  %v1587_v46 = vld [vmem:[%s1916_s1] sm:$0xff] }
 0x3ef   : > { %v931_v47 = vpack.c.bf16 %v930_v39, %v930_v39  ;;  %1675 = vrcp.f32 %v995_v38  ;;  %v1656_v38 = vld [vmem:[%s2127_s21] ss:$0 sm:$0xff]  ;;  %v1588_v39 = vld [vmem:[%s1916_s1 + $0x8] sm:$0xff] }
 0x3f0   : > { %1677 = vrcp.f32 %v1740_v13 }
 0x3f1   : > { %1534 = vmatmul.msk.bf16.vlgmr.msrb.gmra.mxu2 %vm832_vm7, %v931_v47  ;;  %v1657_v47 = vld [vmem:[%s2129_s19] ss:$0 sm:$0xff] }
 0x3f2   : > { %1265 = vmatpush.bf16.msra.mxu3 %v1588_v39 }
 0x3f4   : > { %v1674_v48 = vpop.eup %1673 }
 0x3f5   : > { %v1064_v49 = vmul.f32 %v1674_v48, %v1668_v31  ;;  %v1676_v50 = vpop.eup %1675 }
 0x3f6   : > { %v997_v51 = vmul.f32 %v1676_v50, %v1664_v25  ;;  %v1678_v14 = vpop.eup %1677  ;;  %v1585_v25 = vld [vmem:[%s1902_s3] sm:$0xff]  ;;  %1266 = vmatpush.bf16.msra.mxu3 %v1587_v46 }
 0x3f7   : > { %v1065_v52 = vpack.c.bf16 %v1064_v49, %v1064_v49  ;;  %v1138_v15 = vmul.f32 32.0, %v1678_v14  ;;  %vm1142_vm12 = vweird.f32 %v1678_v14 }
 0x3f8   : > { %v998_v55 = vpack.c.bf16 %v997_v51, %v997_v51 }
 0x3f9   : > { %v1139_v16 = vsub.f32 1.0, %v1138_v15 }
 0x3fb   : > { %v1140_v17 = vmul.f32 %v1678_v14, %v1139_v16 }
 0x3fd   : > { %v1141_v18 = vadd.f32 %v1678_v14, %v1140_v17  ;;  %v1659_v17 = vld [vmem:[%s727_s22] ss:$0 sm:$0xff] }
 0x3ff   : > { %v2007_v19 = vsel %vm1142_vm12, %v1678_v14, %v1141_v18 }
 0x400   : > { %v1000_v53 = vpop.permute.xlu0 %999 }
 0x401   : > { %1538 = vmatmul.msk.bf16.vlgmr.msra.gmra.mxu2 %vm832_vm7, %v1065_v52  ;;  %v1005_v54 = vsel %vm874_vm8, %v1000_v53, 0 }
 0x402   : > { %1014 = vmatpush.bf16.msrb.mxu1 %v1005_v54 }
 0x405   : > { %1536 = vmatmul.msk.bf16.vlgmr.msrb.gmra.mxu1 %vm832_vm7, %v998_v55 }
 0x406   : > { %1206 = vmatpush.bf16.msra.mxu1 %v1586_v24 }
 0x40a   : > { %1207 = vmatpush.bf16.msra.mxu1 %v1585_v25 }
 0x456   : > { %v887_v56 = vpop.f32.mrf.mxu2 }
 0x457   : > { %891 = vst.msk [vmem:[#allocation4] sm:$0xff] %vm832_vm7, %v887_v56 }
 0x45e   : > { %v889_v57 = vpop.f32.mrf.mxu2 }
 0x474   : > { %v949_v58 = vpop.f32.mrf.mxu2 }
 0x475   : > { %954 = vrot.lane.b32.xlu1 %v949_v58, %s1737_s25 }
 0x47c   : > { %v951_v59 = vpop.f32.mrf.mxu2 }
 0x482   : > { %v1016_v60 = vpop.f32.mrf.mxu1 }
 0x483   : > { %1021 = vrot.lane.b32.xlu2 %v1016_v60, %s1738_s24 }
 0x484   : > { %v1083_v61 = vpop.f32.mrf.mxu2 }
 0x485   : > { %1088 = vrot.lane.b32.xlu1 %v1083_v61, %s1739_s26  ;;  %v1658_v61 = vld [vmem:[%s724_s18] ss:$0 sm:$0xff] }
 0x48a   : > { %v1018_v62 = vpop.f32.mrf.mxu1 }
 0x48c   : > { %v1085_v63 = vpop.f32.mrf.mxu2 }
 0x4dd   : > { %v1022_v3 = vpop.permute.xlu2 %1021 }
 0x4e7   : > { %v955_v2 = vpop.permute.xlu1 %954 }
 0x4e8   : > { %958 = vst.msk [vmem:[#allocation4] sm:$0xff] %vm957_vm9, %v955_v2 }
 0x4e9   : > { %1025 = vst.msk [vmem:[#allocation4] sm:$0xff] %vm1024_vm10, %v1022_v3 }
 0x4f7   : > { %v1089_v4 = vpop.permute.xlu1 %1088 }
 0x4f8   : > { %1092 = vst.msk [vmem:[#allocation4] sm:$0xff] %vm1091_vm11, %v1089_v4 }
 0x4ff   : > { %v1093_v5 = vld [vmem:[#allocation4] sm:$0xff] }
 0x500   : > { %v1094_v6 = vpack.c.bf16 %v1093_v5, %v1093_v5 }
 0x502   : > { %1547 = vmatmul.msk.bf16.vlgmr.msra.gmra.mxu0 %vm805_vm5, %v1094_v6 }
 0x57f   : > { %v1127_v8 = vpop.f32.mrf.mxu0 }
 0x580   : > { %v1128_v9 = vadd.f32 %v1654_v7, %v1127_v8 }
 0x582   : > { %v1131_v10 = vadd.f32 %v1128_v9, %v1943_v32 }
 0x584   : > { %v1134_v11 = vsel %vm805_vm5, %v1131_v10, 0.0 }
 0x585   : > { %1135 = vadd.xlane.f32.xlu2 %v1134_v11 }
 0x587   : > { %v1129_v12 = vpop.f32.mrf.mxu0 }
 0x5f8   : > { %v1136_v20 = vpop.xlane.xlu2 %1135 }
 0x5f9   : > { %v1144_v21 = vmul.f32 %v2007_v19, %v1136_v20 }
 0x5fb   : > { %v1145_v32 = vsub.f32 %v1131_v10, %v1144_v21 }
 0x5fd   : > { %v1146_v22 = vmul.f32 %v1145_v32, %v1145_v32 }
 0x5ff   : > { %v1147_v23 = vsel %vm805_vm5, %v1146_v22, 0.0 }
 0x600   : > { %1148 = vadd.xlane.f32.xlu1 %v1147_v23 }
 0x673   : > { %v1149_v26 = vpop.xlane.xlu1 %1148 }
 0x674   : > { %v1150_v27 = vmul.f32 %v1149_v26, %v2007_v19 }
 0x676   : > { %v1151_v28 = vadd.f32 1e-12, %v1150_v27 }
 0x678   : > { %1679 = vrsqrt.f32 %v1151_v28  ;;  %vm1158_vm14 = vweird.f32 %v1151_v28 }
 0x67e   : > { %v1680_v29 = vpop.eup %1679 }
 0x67f   : > { %v1153_v30 = vmul.f32 %v1680_v29, %v1151_v28  ;;  %vm1159_vm13 = vweird.f32 %v1680_v29 }
 0x680   : > { %vm1160_vm15 = vmor %vm1158_vm14, %vm1159_vm13 }
 0x681   : > { %v1154_v31 = vmul.f32 %v1680_v29, %v1153_v30 }
 0x683   : > { %v1155_v33 = vmul.f32 0.5, %v1154_v31 }
 0x685   : > { %v1156_v34 = vsub.f32 1.5, %v1155_v33 }
 0x687   : > { %v1157_v35 = vmul.f32 %v1680_v29, %v1156_v34 }
 0x689   : > { %v1161_v37 = vsel %vm1160_vm15, %v1680_v29, %v1157_v35 }
 0x68a   : > { %v1162_v40 = vmul.f32 %v1161_v37, %v1145_v32 }
 0x68c   : > { %v1166_v41 = vmul.f32 %v1655_v36, %v1162_v40 }
 0x68e   : > { %v1170_v42 = vadd.f32 %v1656_v38, %v1166_v41 }
 0x690   : > { %v1171_v43 = vpack.c.bf16 %v1170_v42, %v1170_v42  ;;  %v1176_v62 = vadd.f32 %v1658_v61, %v1170_v42 }
 0x692   : > { %1556 = vmatmul.msk.bf16.vlgmr.msra.gmra.mxu1 %vm805_vm5, %v1171_v43 }
 0x70f   : > { %v1209_v48 = vpop.f32.mrf.mxu1 }
 0x710   : > { %v1210_v49 = vadd.f32 %v1657_v47, %v1209_v48 }
 0x712   : > { %v1214_v50 = vmul.f32 0.044715, %v1210_v49  ;;  %v1213_v57 = vmul.f32 0.5, %v1210_v49 }
 0x714   : > { %v1215_v51 = vmul.f32 %v1214_v50, %v1210_v49 }
 0x716   : > { %v1216_v52 = vmul.f32 %v1215_v51, %v1210_v49 }
 0x717   : > { %v1211_v53 = vpop.f32.mrf.mxu1 }
 0x718   : > { %v1217_v54 = vadd.f32 %v1216_v52, %v1210_v49 }
 0x71a   : > { %v1218_v55 = vmul.f32 0.7978846, %v1217_v54 }
 0x71c   : > { %1681 = vtanh.f32 %v1218_v55 }
 0x722   : > { %v1682_v56 = vpop.eup %1681 }
 0x723   : > { %v1220_v58 = vadd.f32 1.0, %v1682_v56 }
 0x725   : > { %v1221_v59 = vmul.f32 %v1220_v58, %v1213_v57 }
 0x727   : > { %v1222_v60 = vpack.c.bf16 %v1221_v59, %v1221_v59 }
 0x729   : > { %1573 = vmatmul.msk.bf16.vlgmr.msra.gmra.mxu3 %vm1255_vm0, %v1222_v60 }
 0x7ac   : > { %v1268_v63 = vpop.f32.mrf.mxu3 }
 0x7ad   : > { %v1272_v0 = vadd.f32 %v1268_v63, %v1176_v62 }
 0x7af   : > { %v1275_v1 = vsel %vm805_vm5, %v1272_v0, 0.0 }
 0x7b0   : > { %1276 = vadd.xlane.f32.xlu0 %v1275_v1 }
 0x7b4   : > { %v1270_v2 = vpop.f32.mrf.mxu3 }
 0x823   : > { %v1277_v3 = vpop.xlane.xlu0 %1276 }
 0x824   : > { %v1278_v4 = vmul.f32 %v1277_v3, %v2007_v19 }
 0x826   : > { %v1279_v5 = vsub.f32 %v1272_v0, %v1278_v4 }
 0x828   : > { %v1280_v6 = vmul.f32 %v1279_v5, %v1279_v5 }
 0x82a   : > { %v1281_v7 = vsel %vm805_vm5, %v1280_v6, 0.0 }
 0x82b   : > { %1282 = vadd.xlane.f32.xlu2 %v1281_v7 }
 0x89e   : > { %v1283_v8 = vpop.xlane.xlu2 %1282 }
 0x89f   : > { %v1284_v9 = vmul.f32 %v1283_v8, %v2007_v19  ;;  %v1660_v19 = vld [vmem:[%s730_s10] ss:$0 sm:$0xff] }
 0x8a1   : > { %v1285_v10 = vadd.f32 1e-12, %v1284_v9 }
 0x8a3   : > { %1683 = vrsqrt.f32 %v1285_v10  ;;  %vm1292_vm2 = vweird.f32 %v1285_v10 }
 0x8a9   : > { %v1684_v11 = vpop.eup %1683 }
 0x8aa   : > { %v1287_v12 = vmul.f32 %v1684_v11, %v1285_v10  ;;  %vm1293_vm1 = vweird.f32 %v1684_v11 }
 0x8ab   : > { %vm1294_vm3 = vmor %vm1292_vm2, %vm1293_vm1 }
 0x8ac   : > { %v1288_v13 = vmul.f32 %v1684_v11, %v1287_v12 }
 0x8ae   : > { %v1289_v14 = vmul.f32 0.5, %v1288_v13 }
 0x8b0   : > { %v1290_v15 = vsub.f32 1.5, %v1289_v14 }
 0x8b2   : > { %v1291_v16 = vmul.f32 %v1684_v11, %v1290_v15 }
 0x8b4   : > { %v1295_v18 = vsel %vm1294_vm3, %v1684_v11, %v1291_v16 }
 0x8b5   : > { %v1296_v20 = vmul.f32 %v1295_v18, %v1279_v5 }
 0x8b7   : > { %v1300_v21 = vmul.f32 %v1659_v17, %v1296_v20  ;;  %1309 = sbr.rel (%p1574_p8) target bundleno = 2239 (0x8bf), region = 92 }
 0x8b9   : > { %v1304_v32 = vadd.f32 %v1660_v19, %v1300_v21 }
 0x8bb   : > { %1305 = vst.msk [vmem:[#allocation2] sm:$0xff] %vm805_vm5, %v1304_v32 }
 0x8bc   : > { %v1310_v22 = vpack.c.bf16 %v1304_v32, %v1304_v32  ;;  %vm1311_vm4 = vcmask 257024  }
 0x8be   : > { %1312 = vst.msk [vmem:[%s1929_s11] sm:$0xf] %vm1311_vm4, %v1310_v22 }
 0x8bf PF: > { %s2132_s22 = sld [smem:[#allocation8_spill]] }
 0x8c0   : > { %s2133_s21 = sld [smem:[#allocation6_spill]] }
 0x8c1   : > { %s2135_s23 = sld [smem:[#allocation9_spill]] }
 0x8c2   : > { %s2136_s24 = sld [smem:[#allocation10_spill]] }
 0x8c5   : > { %s26_s25 = sadd.s32 1, %s2132_s22   ;;  %s2134_s22 = sld [smem:[#allocation7_spill]] }
 0x8c6   : > { %p23_p9 = scmp.ge.s32.totalorder %s26_s25, 6  }
 0x8c8   :  { %25 = sbr.rel (!%p23_p9) target bundleno = 11 (0xb), region = 161 }

</bundles_post_ra>
